<compile_context>
chip_gen: v6e
topology: v6e:2x2x1
jax: 0.10.0
libtpu: 0.0.40
codegen_flags: <defaults>
</compile_context>

<pallas_src>
import functools

import jax
import jax.numpy as jnp
from jax import lax
from jax.experimental import pallas as pl
from jax.experimental.pallas import tpu as pltpu

_LANE = 128


def _conv_stats_kernel(x_ref, w_ref, conv_ref, sum_ref, sumsq_ref, *, H, W):
    """One image per grid step: 3x3 'same' conv + per-channel BN partial sums.

    x_ref:     (H+2, W+2, Cin)    halo-padded NHWC image (compute dtype)
    w_ref:     (3, 3, Cin, Cout_p) conv weights (compute dtype, Cout padded to 128*k)
    conv_ref:  (H*W, Cout_p) f32  conv output block for this image
    sum_ref:   (1, Cout_p)   f32  per-channel sum, accumulated across the grid
    sumsq_ref: (1, Cout_p)   f32  per-channel sum of squares, accumulated across the grid
    """
    n = pl.program_id(0)

    @pl.when(n == 0)
    def _():
        sum_ref[...] = jnp.zeros_like(sum_ref)
        sumsq_ref[...] = jnp.zeros_like(sumsq_ref)

    # im2col-free conv: 9 shifted-view matmuls, f32 accumulation in the VMEM
    # output block (no 9x-expanded patch array ever touches HBM).
    first = True
    for kh in range(3):
        for kw in range(3):
            xs = x_ref[kh:kh + H, kw:kw + W, :]           # (H, W, Cin)
            xs = xs.reshape(H * W, xs.shape[-1])          # (H*W, Cin)
            part = jnp.dot(xs, w_ref[kh, kw],
                           preferred_element_type=jnp.float32)
            if first:
                conv_ref[...] = part
                first = False
            else:
                conv_ref[...] += part

    # One-pass BN statistics (sum and sum-of-squares) for this tile.
    c = conv_ref[...]
    sum_ref[...] += jnp.sum(c, axis=0, keepdims=True)
    sumsq_ref[...] += jnp.sum(c * c, axis=0, keepdims=True)


def _bn_relu_kernel(c_ref, scale_ref, shift_ref, o_ref):
    """Normalize + affine + ReLU on a lane-dense (TM, Cout_p) row tile."""
    y = c_ref[...] * scale_ref[...] + shift_ref[...]
    o_ref[...] = jnp.maximum(y, 0.0).astype(o_ref.dtype)


def _pick_row_tile(m):
    for t in (4096, 2048, 1024, 512, 256, 128, 64, 32, 16, 8):
        if m % t == 0:
            return t
    return m


def single_conv_layer_nhwc(x_nhwc, weight_oihw, gamma, beta, *, eps=1e-5,
                           compute_dtype=jnp.bfloat16, out_dtype=jnp.float32):
    """Forward of SingleConvLayer in NHWC (preferred layout, no transpose round-trip).

    x_nhwc:      (N, H, W, Cin)
    weight_oihw: (Cout, Cin, 3, 3)   PyTorch Conv2d weight layout
    gamma, beta: (Cout,)
    returns:     (N, H, W, Cout) out_dtype
    """
    N, H, W, Cin = x_nhwc.shape
    Cout, cin_w, KH, KW = weight_oihw.shape
    assert (KH, KW) == (3, 3) and cin_w == Cin
    Cout_p = ((Cout + _LANE - 1) // _LANE) * _LANE
    HW = H * W
    M = N * HW

    # ---- glue: halo pad + weight relayout (pure data movement, cast to bf16 first) ----
    xpad = jnp.pad(x_nhwc.astype(compute_dtype), ((0, 0), (1, 1), (1, 1), (0, 0)))
    w = jnp.transpose(weight_oihw, (2, 3, 1, 0))                   # (3,3,Cin,Cout)
    w = jnp.pad(w, ((0, 0), (0, 0), (0, 0), (0, Cout_p - Cout))).astype(compute_dtype)

    # ---- pass 1: conv + per-channel sum / sum-of-squares (grid over batch) ----
    # TODO(synk): tile H with halo'd manual DMA for very large feature maps
    # (this version holds one full padded image + its conv output per grid step).
    conv, csum, csumsq = pl.pallas_call(
        functools.partial(_conv_stats_kernel, H=H, W=W),
        grid_spec=pltpu.PrefetchScalarGridSpec(
            num_scalar_prefetch=0,
            grid=(N,),
            in_specs=[
                pl.BlockSpec((None, H + 2, W + 2, Cin), lambda n: (n, 0, 0, 0)),
                pl.BlockSpec((3, 3, Cin, Cout_p), lambda n: (0, 0, 0, 0)),
            ],
            out_specs=(
                pl.BlockSpec((None, HW, Cout_p), lambda n: (n, 0, 0)),
                pl.BlockSpec((1, Cout_p), lambda n: (0, 0)),
                pl.BlockSpec((1, Cout_p), lambda n: (0, 0)),
            ),
        ),
        out_shape=(
            jax.ShapeDtypeStruct((N, HW, Cout_p), jnp.float32),
            jax.ShapeDtypeStruct((1, Cout_p), jnp.float32),
            jax.ShapeDtypeStruct((1, Cout_p), jnp.float32),
        ),
        # BN stats accumulate across the batch axis -> must stay sequential.
        compiler_params=pltpu.CompilerParams(dimension_semantics=("arbitrary",)),
    )(xpad, w)

    # ---- tiny per-channel fold (2*Cout numbers; not a hot path) ----
    cnt = jnp.float32(M)
    mean = csum / cnt
    var = jnp.maximum(csumsq / cnt - mean * mean, 0.0)             # biased var (BN train mode)
    gamma_p = jnp.pad(gamma.astype(jnp.float32), (0, Cout_p - Cout),
                      constant_values=1.0).reshape(1, Cout_p)
    beta_p = jnp.pad(beta.astype(jnp.float32), (0, Cout_p - Cout)).reshape(1, Cout_p)
    scale = lax.rsqrt(var + eps) * gamma_p                         # fold gamma into inv-std
    shift = beta_p - mean * scale

    # ---- pass 2: normalize + affine + ReLU (row-tiled, double-buffered, parallel) ----
    conv2 = conv.reshape(M, Cout_p)                                # metadata-only reshape
    TM = _pick_row_tile(M)
    y = pl.pallas_call(
        _bn_relu_kernel,
        grid_spec=pltpu.PrefetchScalarGridSpec(
            num_scalar_prefetch=0,
            grid=(M // TM,),
            in_specs=[
                pl.BlockSpec((TM, Cout_p), lambda i: (i, 0)),
                pl.BlockSpec((1, Cout_p), lambda i: (0, 0)),
                pl.BlockSpec((1, Cout_p), lambda i: (0, 0)),
            ],
            out_specs=pl.BlockSpec((TM, Cout_p), lambda i: (i, 0)),
        ),
        out_shape=jax.ShapeDtypeStruct((M, Cout_p), out_dtype),
        # independent elementwise pass -> let v7x split it across TensorCores.
        compiler_params=pltpu.CompilerParams(dimension_semantics=("parallel",)),
    )(conv2, scale, shift)

    y = y.reshape(N, H, W, Cout_p)[..., :Cout]
    return y


def single_conv_layer(x_nchw, weight_oihw, gamma, beta, *, eps=1e-5,
                      compute_dtype=jnp.bfloat16):
    """NCHW (PyTorch-convention) wrapper. Prefer single_conv_layer_nhwc when the
    surrounding network is NHWC to avoid the layout round-trips."""
    x_nhwc = jnp.transpose(x_nchw, (0, 2, 3, 1))
    y = single_conv_layer_nhwc(x_nhwc, weight_oihw, gamma, beta, eps=eps,
                               compute_dtype=compute_dtype, out_dtype=jnp.float32)
    return jnp.transpose(y, (0, 3, 1, 2))


def _reference(x_nchw, weight_oihw, gamma, beta, eps=1e-5):
    """Pure-JAX reference (f32 conv + training-mode BN + ReLU)."""
    conv = lax.conv_general_dilated(
        x_nchw, weight_oihw, window_strides=(1, 1), padding=((1, 1), (1, 1)),
        dimension_numbers=("NCHW", "OIHW", "NCHW"),
        precision=lax.Precision.HIGHEST,
    )
    mean = jnp.mean(conv, axis=(0, 2, 3), keepdims=True)
    var = jnp.mean((conv - mean) ** 2, axis=(0, 2, 3), keepdims=True)
    y = (conv - mean) * lax.rsqrt(var + eps)
    y = y * gamma.reshape(1, -1, 1, 1) + beta.reshape(1, -1, 1, 1)
    return jnp.maximum(y, 0.0)


if __name__ == "__main__":
    # Small shapes consistent with the module: batch=2, fan_in=4, fan_out=8, spatial=16.
    N, Cin, Cout, H, W = 2, 4, 8, 16, 16
    eps = 1e-5

    key = jax.random.PRNGKey(0)
    kx, kw = jax.random.split(key)
    x = jax.random.normal(kx, (N, Cin, H, W), dtype=jnp.float32)
    fan_in = Cin * 3 * 3
    weight = jax.random.normal(kw, (Cout, Cin, 3, 3), dtype=jnp.float32) * (2.0 / fan_in) ** 0.5
    gamma = jnp.ones((Cout,), dtype=jnp.float32)   # PyTorch BN init
    beta = jnp.zeros((Cout,), dtype=jnp.float32)

    ref = jax.block_until_ready(_reference(x, weight, gamma, beta, eps=eps))

    # f32 compute mode: tight tolerance against the f32 reference.
    out_f32 = jax.block_until_ready(
        single_conv_layer(x, weight, gamma, beta, eps=eps, compute_dtype=jnp.float32))
    assert out_f32.shape == (N, Cout, H, W)
    assert jnp.allclose(out_f32, ref, rtol=1e-4, atol=1e-3), \
        float(jnp.max(jnp.abs(out_f32 - ref)))

    # bf16 matmul-input mode (default, perf path): looser tolerance from input quantization.
    out_bf16 = jax.block_until_ready(
        single_conv_layer(x, weight, gamma, beta, eps=eps, compute_dtype=jnp.bfloat16))
    assert out_bf16.shape == (N, Cout, H, W)
    assert jnp.allclose(out_bf16, ref, rtol=2e-2, atol=2e-2), \
        float(jnp.max(jnp.abs(out_bf16 - ref)))

    print("KERNEL_OK")
</pallas_src>

<mosaic_0001>
module attributes {stable_mosaic.version = 11 : i64} {
  func.func @_conv_stats_kernel(%arg0: i32, %arg1: memref<1x18x18x4xf32, #tpu.memory_space<vmem>>, %arg2: memref<3x3x4x128xf32, #tpu.memory_space<vmem>>, %arg3: memref<1x256x128xf32, #tpu.memory_space<vmem>>, %arg4: memref<1x128xf32, #tpu.memory_space<vmem>>, %arg5: memref<1x128xf32, #tpu.memory_space<vmem>>) attributes {dimension_semantics = [#tpu.dimension_semantics<arbitrary>], iteration_bounds = array<i64: 2>, scalar_prefetch = 0 : i64, scratch_operands = 0 : i64, tpu.core_type = #tpu.core_type<tc>, window_params = [{transform_indices = @transform_0, window_bounds = array<i64: 1, 18, 18, 4>}, {pipeline_mode = #tpu.pipeline_mode<synchronous>, transform_indices = @transform_1, window_bounds = array<i64: 3, 3, 4, 128>}, {transform_indices = @transform_2, window_bounds = array<i64: 1, 256, 128>}, {pipeline_mode = #tpu.pipeline_mode<synchronous>, transform_indices = @transform_3, window_bounds = array<i64: 1, 128>}, {pipeline_mode = #tpu.pipeline_mode<synchronous>, transform_indices = @transform_4, window_bounds = array<i64: 1, 128>}]} {
    %c0_i32 = arith.constant 0 : i32
    %0 = arith.cmpi eq, %arg0, %c0_i32 : i32
    %1 = arith.extui %0 : i1 to i32
    %c0_i32_0 = arith.constant 0 : i32
    %2 = arith.cmpi ne, %1, %c0_i32_0 : i32
    scf.if %2 {
      %cst_142 = arith.constant 0.000000e+00 : f32
      %121 = vector.broadcast %cst_142 : f32 to vector<1x128xf32>
      %c0_143 = arith.constant 0 : index
      %c0_144 = arith.constant 0 : index
      %122 = vector.load %arg4[%c0_143, %c0_144] : memref<1x128xf32, #tpu.memory_space<vmem>>, vector<1x128xf32>
      tpu.vector_store %arg4[%c0_143, %c0_144], %121 {strides = array<i32>} : memref<1x128xf32, #tpu.memory_space<vmem>>, vector<1x128xf32>,
      %cst_145 = arith.constant 0.000000e+00 : f32
      %123 = vector.broadcast %cst_145 : f32 to vector<1x128xf32>
      %c0_146 = arith.constant 0 : index
      %c0_147 = arith.constant 0 : index
      %124 = vector.load %arg5[%c0_146, %c0_147] : memref<1x128xf32, #tpu.memory_space<vmem>>, vector<1x128xf32>
      tpu.vector_store %arg5[%c0_146, %c0_147], %123 {strides = array<i32>} : memref<1x128xf32, #tpu.memory_space<vmem>>, vector<1x128xf32>,
    } else {
    }
    %c0 = arith.constant 0 : index
    %c0_1 = arith.constant 0 : index
    %c0_2 = arith.constant 0 : index
    %c0_3 = arith.constant 0 : index
    %3 = vector.load %arg1[%c0, %c0_1, %c0_2, %c0_3] : memref<1x18x18x4xf32, #tpu.memory_space<vmem>>, vector<1x16x16x4xf32>
    %4 = vector.shape_cast %3 : vector<1x16x16x4xf32> to vector<16x16x4xf32>
    %5 = vector.shape_cast %4 : vector<16x16x4xf32> to vector<256x4xf32>
    %c0_4 = arith.constant 0 : index
    %c0_5 = arith.constant 0 : index
    %c0_6 = arith.constant 0 : index
    %c0_7 = arith.constant 0 : index
    %6 = vector.load %arg2[%c0_4, %c0_5, %c0_6, %c0_7] : memref<3x3x4x128xf32, #tpu.memory_space<vmem>>, vector<1x1x4x128xf32>
    %7 = vector.shape_cast %6 : vector<1x1x4x128xf32> to vector<4x128xf32>
    %cst = arith.constant dense<0.000000e+00> : vector<256x128xf32>
    %8 = tpu.matmul %5, %7, %cst {dimension_numbers = #tpu.dot_dimension_numbers<[1], [0], [0], [1], [0, 0, 1, 1], [], []>} : vector<256x4xf32>, vector<4x128xf32>, vector<256x128xf32> -> vector<256x128xf32>
    %c0_8 = arith.constant 0 : index
    %c0_9 = arith.constant 0 : index
    %c0_10 = arith.constant 0 : index
    %9 = vector.load %arg3[%c0_8, %c0_9, %c0_10] : memref<1x256x128xf32, #tpu.memory_space<vmem>>, vector<1x256x128xf32>
    %10 = vector.shape_cast %9 : vector<1x256x128xf32> to vector<256x128xf32>
    %11 = vector.shape_cast %8 : vector<256x128xf32> to vector<1x256x128xf32>
    tpu.vector_store %arg3[%c0_8, %c0_9, %c0_10], %11 {strides = array<i32>} : memref<1x256x128xf32, #tpu.memory_space<vmem>>, vector<1x256x128xf32>,
    %c0_11 = arith.constant 0 : index
    %c0_12 = arith.constant 0 : index
    %c1 = arith.constant 1 : index
    %c0_13 = arith.constant 0 : index
    %12 = vector.load %arg1[%c0_11, %c0_12, %c1, %c0_13] : memref<1x18x18x4xf32, #tpu.memory_space<vmem>>, vector<1x16x16x4xf32>
    %13 = vector.shape_cast %12 : vector<1x16x16x4xf32> to vector<16x16x4xf32>
    %14 = vector.shape_cast %13 : vector<16x16x4xf32> to vector<256x4xf32>
    %c0_14 = arith.constant 0 : index
    %c1_15 = arith.constant 1 : index
    %c0_16 = arith.constant 0 : index
    %c0_17 = arith.constant 0 : index
    %15 = vector.load %arg2[%c0_14, %c1_15, %c0_16, %c0_17] : memref<3x3x4x128xf32, #tpu.memory_space<vmem>>, vector<1x1x4x128xf32>
    %16 = vector.shape_cast %15 : vector<1x1x4x128xf32> to vector<4x128xf32>
    %cst_18 = arith.constant dense<0.000000e+00> : vector<256x128xf32>
    %17 = tpu.matmul %14, %16, %cst_18 {dimension_numbers = #tpu.dot_dimension_numbers<[1], [0], [0], [1], [0, 0, 1, 1], [], []>} : vector<256x4xf32>, vector<4x128xf32>, vector<256x128xf32> -> vector<256x128xf32>
    %c0_19 = arith.constant 0 : index
    %c0_20 = arith.constant 0 : index
    %c0_21 = arith.constant 0 : index
    %18 = vector.load %arg3[%c0_19, %c0_20, %c0_21] : memref<1x256x128xf32, #tpu.memory_space<vmem>>, vector<1x256x128xf32>
    %19 = vector.shape_cast %18 : vector<1x256x128xf32> to vector<256x128xf32>
    %20 = arith.addf %19, %17 : vector<256x128xf32>
    %c0_22 = arith.constant 0 : index
    %c0_23 = arith.constant 0 : index
    %c0_24 = arith.constant 0 : index
    %21 = vector.load %arg3[%c0_22, %c0_23, %c0_24] : memref<1x256x128xf32, #tpu.memory_space<vmem>>, vector<1x256x128xf32>
    %22 = vector.shape_cast %21 : vector<1x256x128xf32> to vector<256x128xf32>
    %23 = vector.shape_cast %20 : vector<256x128xf32> to vector<1x256x128xf32>
    tpu.vector_store %arg3[%c0_22, %c0_23, %c0_24], %23 {strides = array<i32>} : memref<1x256x128xf32, #tpu.memory_space<vmem>>, vector<1x256x128xf32>,
    %c0_25 = arith.constant 0 : index
    %c0_26 = arith.constant 0 : index
    %c2 = arith.constant 2 : index
    %c0_27 = arith.constant 0 : index
    %24 = vector.load %arg1[%c0_25, %c0_26, %c2, %c0_27] : memref<1x18x18x4xf32, #tpu.memory_space<vmem>>, vector<1x16x16x4xf32>
    %25 = vector.shape_cast %24 : vector<1x16x16x4xf32> to vector<16x16x4xf32>
    %26 = vector.shape_cast %25 : vector<16x16x4xf32> to vector<256x4xf32>
    %c0_28 = arith.constant 0 : index
    %c2_29 = arith.constant 2 : index
    %c0_30 = arith.constant 0 : index
    %c0_31 = arith.constant 0 : index
    %27 = vector.load %arg2[%c0_28, %c2_29, %c0_30, %c0_31] : memref<3x3x4x128xf32, #tpu.memory_space<vmem>>, vector<1x1x4x128xf32>
    %28 = vector.shape_cast %27 : vector<1x1x4x128xf32> to vector<4x128xf32>
    %cst_32 = arith.constant dense<0.000000e+00> : vector<256x128xf32>
    %29 = tpu.matmul %26, %28, %cst_32 {dimension_numbers = #tpu.dot_dimension_numbers<[1], [0], [0], [1], [0, 0, 1, 1], [], []>} : vector<256x4xf32>, vector<4x128xf32>, vector<256x128xf32> -> vector<256x128xf32>
    %c0_33 = arith.constant 0 : index
    %c0_34 = arith.constant 0 : index
    %c0_35 = arith.constant 0 : index
    %30 = vector.load %arg3[%c0_33, %c0_34, %c0_35] : memref<1x256x128xf32, #tpu.memory_space<vmem>>, vector<1x256x128xf32>
    %31 = vector.shape_cast %30 : vector<1x256x128xf32> to vector<256x128xf32>
    %32 = arith.addf %31, %29 : vector<256x128xf32>
    %c0_36 = arith.constant 0 : index
    %c0_37 = arith.constant 0 : index
    %c0_38 = arith.constant 0 : index
    %33 = vector.load %arg3[%c0_36, %c0_37, %c0_38] : memref<1x256x128xf32, #tpu.memory_space<vmem>>, vector<1x256x128xf32>
    %34 = vector.shape_cast %33 : vector<1x256x128xf32> to vector<256x128xf32>
    %35 = vector.shape_cast %32 : vector<256x128xf32> to vector<1x256x128xf32>
    tpu.vector_store %arg3[%c0_36, %c0_37, %c0_38], %35 {strides = array<i32>} : memref<1x256x128xf32, #tpu.memory_space<vmem>>, vector<1x256x128xf32>,
    %c0_39 = arith.constant 0 : index
    %c1_40 = arith.constant 1 : index
    %c0_41 = arith.constant 0 : index
    %c0_42 = arith.constant 0 : index
    %36 = vector.load %arg1[%c0_39, %c1_40, %c0_41, %c0_42] : memref<1x18x18x4xf32, #tpu.memory_space<vmem>>, vector<1x16x16x4xf32>
    %37 = vector.shape_cast %36 : vector<1x16x16x4xf32> to vector<16x16x4xf32>
    %38 = vector.shape_cast %37 : vector<16x16x4xf32> to vector<256x4xf32>
    %c1_43 = arith.constant 1 : index
    %c0_44 = arith.constant 0 : index
    %c0_45 = arith.constant 0 : index
    %c0_46 = arith.constant 0 : index
    %39 = vector.load %arg2[%c1_43, %c0_44, %c0_45, %c0_46] : memref<3x3x4x128xf32, #tpu.memory_space<vmem>>, vector<1x1x4x128xf32>
    %40 = vector.shape_cast %39 : vector<1x1x4x128xf32> to vector<4x128xf32>
    %cst_47 = arith.constant dense<0.000000e+00> : vector<256x128xf32>
    %41 = tpu.matmul %38, %40, %cst_47 {dimension_numbers = #tpu.dot_dimension_numbers<[1], [0], [0], [1], [0, 0, 1, 1], [], []>} : vector<256x4xf32>, vector<4x128xf32>, vector<256x128xf32> -> vector<256x128xf32>
    %c0_48 = arith.constant 0 : index
    %c0_49 = arith.constant 0 : index
    %c0_50 = arith.constant 0 : index
    %42 = vector.load %arg3[%c0_48, %c0_49, %c0_50] : memref<1x256x128xf32, #tpu.memory_space<vmem>>, vector<1x256x128xf32>
    %43 = vector.shape_cast %42 : vector<1x256x128xf32> to vector<256x128xf32>
    %44 = arith.addf %43, %41 : vector<256x128xf32>
    %c0_51 = arith.constant 0 : index
    %c0_52 = arith.constant 0 : index
    %c0_53 = arith.constant 0 : index
    %45 = vector.load %arg3[%c0_51, %c0_52, %c0_53] : memref<1x256x128xf32, #tpu.memory_space<vmem>>, vector<1x256x128xf32>
    %46 = vector.shape_cast %45 : vector<1x256x128xf32> to vector<256x128xf32>
    %47 = vector.shape_cast %44 : vector<256x128xf32> to vector<1x256x128xf32>
    tpu.vector_store %arg3[%c0_51, %c0_52, %c0_53], %47 {strides = array<i32>} : memref<1x256x128xf32, #tpu.memory_space<vmem>>, vector<1x256x128xf32>,
    %c0_54 = arith.constant 0 : index
    %c1_55 = arith.constant 1 : index
    %c1_56 = arith.constant 1 : index
    %c0_57 = arith.constant 0 : index
    %48 = vector.load %arg1[%c0_54, %c1_55, %c1_56, %c0_57] : memref<1x18x18x4xf32, #tpu.memory_space<vmem>>, vector<1x16x16x4xf32>
    %49 = vector.shape_cast %48 : vector<1x16x16x4xf32> to vector<16x16x4xf32>
    %50 = vector.shape_cast %49 : vector<16x16x4xf32> to vector<256x4xf32>
    %c1_58 = arith.constant 1 : index
    %c1_59 = arith.constant 1 : index
    %c0_60 = arith.constant 0 : index
    %c0_61 = arith.constant 0 : index
    %51 = vector.load %arg2[%c1_58, %c1_59, %c0_60, %c0_61] : memref<3x3x4x128xf32, #tpu.memory_space<vmem>>, vector<1x1x4x128xf32>
    %52 = vector.shape_cast %51 : vector<1x1x4x128xf32> to vector<4x128xf32>
    %cst_62 = arith.constant dense<0.000000e+00> : vector<256x128xf32>
    %53 = tpu.matmul %50, %52, %cst_62 {dimension_numbers = #tpu.dot_dimension_numbers<[1], [0], [0], [1], [0, 0, 1, 1], [], []>} : vector<256x4xf32>, vector<4x128xf32>, vector<256x128xf32> -> vector<256x128xf32>
    %c0_63 = arith.constant 0 : index
    %c0_64 = arith.constant 0 : index
    %c0_65 = arith.constant 0 : index
    %54 = vector.load %arg3[%c0_63, %c0_64, %c0_65] : memref<1x256x128xf32, #tpu.memory_space<vmem>>, vector<1x256x128xf32>
    %55 = vector.shape_cast %54 : vector<1x256x128xf32> to vector<256x128xf32>
    %56 = arith.addf %55, %53 : vector<256x128xf32>
    %c0_66 = arith.constant 0 : index
    %c0_67 = arith.constant 0 : index
    %c0_68 = arith.constant 0 : index
    %57 = vector.load %arg3[%c0_66, %c0_67, %c0_68] : memref<1x256x128xf32, #tpu.memory_space<vmem>>, vector<1x256x128xf32>
    %58 = vector.shape_cast %57 : vector<1x256x128xf32> to vector<256x128xf32>
    %59 = vector.shape_cast %56 : vector<256x128xf32> to vector<1x256x128xf32>
    tpu.vector_store %arg3[%c0_66, %c0_67, %c0_68], %59 {strides = array<i32>} : memref<1x256x128xf32, #tpu.memory_space<vmem>>, vector<1x256x128xf32>,
    %c0_69 = arith.constant 0 : index
    %c1_70 = arith.constant 1 : index
    %c2_71 = arith.constant 2 : index
    %c0_72 = arith.constant 0 : index
    %60 = vector.load %arg1[%c0_69, %c1_70, %c2_71, %c0_72] : memref<1x18x18x4xf32, #tpu.memory_space<vmem>>, vector<1x16x16x4xf32>
    %61 = vector.shape_cast %60 : vector<1x16x16x4xf32> to vector<16x16x4xf32>
    %62 = vector.shape_cast %61 : vector<16x16x4xf32> to vector<256x4xf32>
    %c1_73 = arith.constant 1 : index
    %c2_74 = arith.constant 2 : index
    %c0_75 = arith.constant 0 : index
    %c0_76 = arith.constant 0 : index
    %63 = vector.load %arg2[%c1_73, %c2_74, %c0_75, %c0_76] : memref<3x3x4x128xf32, #tpu.memory_space<vmem>>, vector<1x1x4x128xf32>
    %64 = vector.shape_cast %63 : vector<1x1x4x128xf32> to vector<4x128xf32>
    %cst_77 = arith.constant dense<0.000000e+00> : vector<256x128xf32>
    %65 = tpu.matmul %62, %64, %cst_77 {dimension_numbers = #tpu.dot_dimension_numbers<[1], [0], [0], [1], [0, 0, 1, 1], [], []>} : vector<256x4xf32>, vector<4x128xf32>, vector<256x128xf32> -> vector<256x128xf32>
    %c0_78 = arith.constant 0 : index
    %c0_79 = arith.constant 0 : index
    %c0_80 = arith.constant 0 : index
    %66 = vector.load %arg3[%c0_78, %c0_79, %c0_80] : memref<1x256x128xf32, #tpu.memory_space<vmem>>, vector<1x256x128xf32>
    %67 = vector.shape_cast %66 : vector<1x256x128xf32> to vector<256x128xf32>
    %68 = arith.addf %67, %65 : vector<256x128xf32>
    %c0_81 = arith.constant 0 : index
    %c0_82 = arith.constant 0 : index
    %c0_83 = arith.constant 0 : index
    %69 = vector.load %arg3[%c0_81, %c0_82, %c0_83] : memref<1x256x128xf32, #tpu.memory_space<vmem>>, vector<1x256x128xf32>
    %70 = vector.shape_cast %69 : vector<1x256x128xf32> to vector<256x128xf32>
    %71 = vector.shape_cast %68 : vector<256x128xf32> to vector<1x256x128xf32>
    tpu.vector_store %arg3[%c0_81, %c0_82, %c0_83], %71 {strides = array<i32>} : memref<1x256x128xf32, #tpu.memory_space<vmem>>, vector<1x256x128xf32>,
    %c0_84 = arith.constant 0 : index
    %c2_85 = arith.constant 2 : index
    %c0_86 = arith.constant 0 : index
    %c0_87 = arith.constant 0 : index
    %72 = vector.load %arg1[%c0_84, %c2_85, %c0_86, %c0_87] : memref<1x18x18x4xf32, #tpu.memory_space<vmem>>, vector<1x16x16x4xf32>
    %73 = vector.shape_cast %72 : vector<1x16x16x4xf32> to vector<16x16x4xf32>
    %74 = vector.shape_cast %73 : vector<16x16x4xf32> to vector<256x4xf32>
    %c2_88 = arith.constant 2 : index
    %c0_89 = arith.constant 0 : index
    %c0_90 = arith.constant 0 : index
    %c0_91 = arith.constant 0 : index
    %75 = vector.load %arg2[%c2_88, %c0_89, %c0_90, %c0_91] : memref<3x3x4x128xf32, #tpu.memory_space<vmem>>, vector<1x1x4x128xf32>
    %76 = vector.shape_cast %75 : vector<1x1x4x128xf32> to vector<4x128xf32>
    %cst_92 = arith.constant dense<0.000000e+00> : vector<256x128xf32>
    %77 = tpu.matmul %74, %76, %cst_92 {dimension_numbers = #tpu.dot_dimension_numbers<[1], [0], [0], [1], [0, 0, 1, 1], [], []>} : vector<256x4xf32>, vector<4x128xf32>, vector<256x128xf32> -> vector<256x128xf32>
    %c0_93 = arith.constant 0 : index
    %c0_94 = arith.constant 0 : index
    %c0_95 = arith.constant 0 : index
    %78 = vector.load %arg3[%c0_93, %c0_94, %c0_95] : memref<1x256x128xf32, #tpu.memory_space<vmem>>, vector<1x256x128xf32>
    %79 = vector.shape_cast %78 : vector<1x256x128xf32> to vector<256x128xf32>
    %80 = arith.addf %79, %77 : vector<256x128xf32>
    %c0_96 = arith.constant 0 : index
    %c0_97 = arith.constant 0 : index
    %c0_98 = arith.constant 0 : index
    %81 = vector.load %arg3[%c0_96, %c0_97, %c0_98] : memref<1x256x128xf32, #tpu.memory_space<vmem>>, vector<1x256x128xf32>
    %82 = vector.shape_cast %81 : vector<1x256x128xf32> to vector<256x128xf32>
    %83 = vector.shape_cast %80 : vector<256x128xf32> to vector<1x256x128xf32>
    tpu.vector_store %arg3[%c0_96, %c0_97, %c0_98], %83 {strides = array<i32>} : memref<1x256x128xf32, #tpu.memory_space<vmem>>, vector<1x256x128xf32>,
    %c0_99 = arith.constant 0 : index
    %c2_100 = arith.constant 2 : index
    %c1_101 = arith.constant 1 : index
    %c0_102 = arith.constant 0 : index
    %84 = vector.load %arg1[%c0_99, %c2_100, %c1_101, %c0_102] : memref<1x18x18x4xf32, #tpu.memory_space<vmem>>, vector<1x16x16x4xf32>
    %85 = vector.shape_cast %84 : vector<1x16x16x4xf32> to vector<16x16x4xf32>
    %86 = vector.shape_cast %85 : vector<16x16x4xf32> to vector<256x4xf32>
    %c2_103 = arith.constant 2 : index
    %c1_104 = arith.constant 1 : index
    %c0_105 = arith.constant 0 : index
    %c0_106 = arith.constant 0 : index
    %87 = vector.load %arg2[%c2_103, %c1_104, %c0_105, %c0_106] : memref<3x3x4x128xf32, #tpu.memory_space<vmem>>, vector<1x1x4x128xf32>
    %88 = vector.shape_cast %87 : vector<1x1x4x128xf32> to vector<4x128xf32>
    %cst_107 = arith.constant dense<0.000000e+00> : vector<256x128xf32>
    %89 = tpu.matmul %86, %88, %cst_107 {dimension_numbers = #tpu.dot_dimension_numbers<[1], [0], [0], [1], [0, 0, 1, 1], [], []>} : vector<256x4xf32>, vector<4x128xf32>, vector<256x128xf32> -> vector<256x128xf32>
    %c0_108 = arith.constant 0 : index
    %c0_109 = arith.constant 0 : index
    %c0_110 = arith.constant 0 : index
    %90 = vector.load %arg3[%c0_108, %c0_109, %c0_110] : memref<1x256x128xf32, #tpu.memory_space<vmem>>, vector<1x256x128xf32>
    %91 = vector.shape_cast %90 : vector<1x256x128xf32> to vector<256x128xf32>
    %92 = arith.addf %91, %89 : vector<256x128xf32>
    %c0_111 = arith.constant 0 : index
    %c0_112 = arith.constant 0 : index
    %c0_113 = arith.constant 0 : index
    %93 = vector.load %arg3[%c0_111, %c0_112, %c0_113] : memref<1x256x128xf32, #tpu.memory_space<vmem>>, vector<1x256x128xf32>
    %94 = vector.shape_cast %93 : vector<1x256x128xf32> to vector<256x128xf32>
    %95 = vector.shape_cast %92 : vector<256x128xf32> to vector<1x256x128xf32>
    tpu.vector_store %arg3[%c0_111, %c0_112, %c0_113], %95 {strides = array<i32>} : memref<1x256x128xf32, #tpu.memory_space<vmem>>, vector<1x256x128xf32>,
    %c0_114 = arith.constant 0 : index
    %c2_115 = arith.constant 2 : index
    %c2_116 = arith.constant 2 : index
    %c0_117 = arith.constant 0 : index
    %96 = vector.load %arg1[%c0_114, %c2_115, %c2_116, %c0_117] : memref<1x18x18x4xf32, #tpu.memory_space<vmem>>, vector<1x16x16x4xf32>
    %97 = vector.shape_cast %96 : vector<1x16x16x4xf32> to vector<16x16x4xf32>
    %98 = vector.shape_cast %97 : vector<16x16x4xf32> to vector<256x4xf32>
    %c2_118 = arith.constant 2 : index
    %c2_119 = arith.constant 2 : index
    %c0_120 = arith.constant 0 : index
    %c0_121 = arith.constant 0 : index
    %99 = vector.load %arg2[%c2_118, %c2_119, %c0_120, %c0_121] : memref<3x3x4x128xf32, #tpu.memory_space<vmem>>, vector<1x1x4x128xf32>
    %100 = vector.shape_cast %99 : vector<1x1x4x128xf32> to vector<4x128xf32>
    %cst_122 = arith.constant dense<0.000000e+00> : vector<256x128xf32>
    %101 = tpu.matmul %98, %100, %cst_122 {dimension_numbers = #tpu.dot_dimension_numbers<[1], [0], [0], [1], [0, 0, 1, 1], [], []>} : vector<256x4xf32>, vector<4x128xf32>, vector<256x128xf32> -> vector<256x128xf32>
    %c0_123 = arith.constant 0 : index
    %c0_124 = arith.constant 0 : index
    %c0_125 = arith.constant 0 : index
    %102 = vector.load %arg3[%c0_123, %c0_124, %c0_125] : memref<1x256x128xf32, #tpu.memory_space<vmem>>, vector<1x256x128xf32>
    %103 = vector.shape_cast %102 : vector<1x256x128xf32> to vector<256x128xf32>
    %104 = arith.addf %103, %101 : vector<256x128xf32>
    %c0_126 = arith.constant 0 : index
    %c0_127 = arith.constant 0 : index
    %c0_128 = arith.constant 0 : index
    %105 = vector.load %arg3[%c0_126, %c0_127, %c0_128] : memref<1x256x128xf32, #tpu.memory_space<vmem>>, vector<1x256x128xf32>
    %106 = vector.shape_cast %105 : vector<1x256x128xf32> to vector<256x128xf32>
    %107 = vector.shape_cast %104 : vector<256x128xf32> to vector<1x256x128xf32>
    tpu.vector_store %arg3[%c0_126, %c0_127, %c0_128], %107 {strides = array<i32>} : memref<1x256x128xf32, #tpu.memory_space<vmem>>, vector<1x256x128xf32>,
    %c0_129 = arith.constant 0 : index
    %c0_130 = arith.constant 0 : index
    %c0_131 = arith.constant 0 : index
    %108 = vector.load %arg3[%c0_129, %c0_130, %c0_131] : memref<1x256x128xf32, #tpu.memory_space<vmem>>, vector<1x256x128xf32>
    %109 = vector.shape_cast %108 : vector<1x256x128xf32> to vector<256x128xf32>
    %c0_132 = arith.constant 0 : index
    %c0_133 = arith.constant 0 : index
    %110 = vector.load %arg4[%c0_132, %c0_133] : memref<1x128xf32, #tpu.memory_space<vmem>>, vector<1x128xf32>
    %cst_134 = arith.constant dense<0.000000e+00> : vector<128xf32>
    %111 = vector.multi_reduction <add>, %109, %cst_134 [0] : vector<256x128xf32> to vector<128xf32>
    %112 = vector.shape_cast %111 : vector<128xf32> to vector<1x128xf32>
    %113 = arith.addf %110, %112 : vector<1x128xf32>
    %c0_135 = arith.constant 0 : index
    %c0_136 = arith.constant 0 : index
    %114 = vector.load %arg4[%c0_135, %c0_136] : memref<1x128xf32, #tpu.memory_space<vmem>>, vector<1x128xf32>
    tpu.vector_store %arg4[%c0_135, %c0_136], %113 {strides = array<i32>} : memref<1x128xf32, #tpu.memory_space<vmem>>, vector<1x128xf32>,
    %c0_137 = arith.constant 0 : index
    %c0_138 = arith.constant 0 : index
    %115 = vector.load %arg5[%c0_137, %c0_138] : memref<1x128xf32, #tpu.memory_space<vmem>>, vector<1x128xf32>
    %116 = arith.mulf %109, %109 : vector<256x128xf32>
    %cst_139 = arith.constant dense<0.000000e+00> : vector<128xf32>
    %117 = vector.multi_reduction <add>, %116, %cst_139 [0] : vector<256x128xf32> to vector<128xf32>
    %118 = vector.shape_cast %117 : vector<128xf32> to vector<1x128xf32>
    %119 = arith.addf %115, %118 : vector<1x128xf32>
    %c0_140 = arith.constant 0 : index
    %c0_141 = arith.constant 0 : index
    %120 = vector.load %arg5[%c0_140, %c0_141] : memref<1x128xf32, #tpu.memory_space<vmem>>, vector<1x128xf32>
    tpu.vector_store %arg5[%c0_140, %c0_141], %119 {strides = array<i32>} : memref<1x128xf32, #tpu.memory_space<vmem>>, vector<1x128xf32>,
    return
  }
  func.func @transform_0(%arg0: i32) -> (i32, i32, i32, i32) {
    %c0_i32 = arith.constant 0 : i32
    %c0_i32_0 = arith.constant 0 : i32
    %c0_i32_1 = arith.constant 0 : i32
    %c0_i32_2 = arith.constant 0 : i32
    return %arg0, %c0_i32, %c0_i32_0, %c0_i32_1 : i32, i32, i32, i32
  }
  func.func @transform_1(%arg0: i32) -> (i32, i32, i32, i32) {
    %c0_i32 = arith.constant 0 : i32
    %c0_i32_0 = arith.constant 0 : i32
    %c0_i32_1 = arith.constant 0 : i32
    %c0_i32_2 = arith.constant 0 : i32
    %c0_i32_3 = arith.constant 0 : i32
    return %c0_i32, %c0_i32_0, %c0_i32_1, %c0_i32_2 : i32, i32, i32, i32
  }
  func.func @transform_2(%arg0: i32) -> (i32, i32, i32) {
    %c0_i32 = arith.constant 0 : i32
    %c0_i32_0 = arith.constant 0 : i32
    %c0_i32_1 = arith.constant 0 : i32
    return %arg0, %c0_i32, %c0_i32_0 : i32, i32, i32
  }
  func.func @transform_3(%arg0: i32) -> (i32, i32) {
    %c0_i32 = arith.constant 0 : i32
    %c0_i32_0 = arith.constant 0 : i32
    %c0_i32_1 = arith.constant 0 : i32
    return %c0_i32, %c0_i32_0 : i32, i32
  }
  func.func @transform_4(%arg0: i32) -> (i32, i32) {
    %c0_i32 = arith.constant 0 : i32
    %c0_i32_0 = arith.constant 0 : i32
    %c0_i32_1 = arith.constant 0 : i32
    return %c0_i32, %c0_i32_0 : i32, i32
  }
}

</mosaic_0001>

<bundles_post_ra>
// kernel: tpu_custom_call.1
= control target key start
LH: loop header
LB: loop body
LE: loop exit
PB: predicated region body
PF: predicated region fallthrough
CT: control target
= control target key end

     0   :  { %10 = vsyncpa [#allocation3], 0  ;;  %s7513_s0 = inlined_call_operand.vmem [shape: f32[2,18,18,4], index: 0, kind: input, shape index: {}]   ;;  %s7514_s1 = inlined_call_operand.vmem [shape: f32[3,3,4,128], index: 1, kind: input, shape index: {}]   ;;  %s7515_s2 = inlined_call_operand.hbm [shape: f32[2,256,128], index: 2, kind: output, shape index: {0}]   ;;  %s7516_s3 = inlined_call_operand.hbm [shape: f32[1,128], index: 3, kind: output, shape index: {1}]   ;;  %s7517_s4 = inlined_call_operand.hbm [shape: f32[1,128], index: 4, kind: output, shape index: {2}]  }
   0x1   :  { %12 = vsyncpa [#allocation3 + $0x1], 0 }
   0x2   :  { %13 = vsyncpa [#allocation5], 0  ;;  %s5951_s15 = smov 0   ;;  %s5953_s16 = smov 0  }
   0x3   :  { %s5955_s17 = smov 0   ;;  %s5957_s18 = smov 0  }
   0x4 LB: > { %s5972_s19 = sadd.s32 4294967295, %s5918_s18   ;;  %s4486_s20 = sadd.s32 4294967294, %s5918_s18   ;;  %s5918_s18 = sphi %s5957_s18, %s7697_s18   ;;  %s5914_s17 = sphi %s5955_s17, %s7696_s17   ;;  %s5910_s16 = sphi %s5953_s16, %s7695_s16   ;;  %s5906_s15 = sphi %s5951_s15, %s7694_s15  }
   0x5   : > { %s5976_s21 = sadd.s32 1, %s5918_s18   ;;  %s73_s22 = sadd.s32 1, %s5914_s17 }
   0x6   : > { %s70_s23 = ssub.s32 %s5918_s18, %s5976_s21  ;;  %p83_p0 = scmp.ne.s32.totalorder %s5914_s17, %s5910_s16 }
   0x7   : > { %p71_p1 = scmp.eq.s32.totalorder %s70_s23, 0  ;;  %p84_p2 = scmp.eq.s32.totalorder %s5972_s19, 1 }
   0x8   : > { %p89_p3 = scmp.ne.s32.totalorder %s5910_s16, %s5906_s15  ;;  %p90_p4 = scmp.eq.s32.totalorder %s4486_s20, 1 }
   0x9   : > { %s5987_s24 = scalar_select %p71_p1, %s5914_s17, %s73_s22  }
   0xa   : > { %p5991_p5 = por %p84_p2, %p83_p0  ;;  %p5995_p6 = por %p90_p4, %p89_p3 }
   0xb   : > { %p4489_p7 = scmp.ge.s32.totalorder %s5918_s18, 1  ;;  %p161_p8 = scmp.lt.s32.totalorder %s5918_s18, 3 }
   0xd   : > { %p162_p9 = pnand %p4489_p7, %p161_p8 }
   0xf   : > { %165 = sbr.rel (%p162_p9) target bundleno = 561 (0x231), region = 28 }
  0x14   : > { %s180_s27 = sand.u32 1, %s5910_s16   ;;  %p187_p10 = scmp.lt.s32.totalorder %s5972_s19, 1 }
  0x15   : > { %s4490_s28 = sshll.u32 %s180_s27, 8  ;;  %p4492_p11 = scmp.ne.s32.totalorder %s5972_s19, 0 }
  0x16   : > { %s188_s29 = scalar_select %p187_p10, %s5972_s19, 1 }
  0x17   : > { %s6011_s8 = scalar_lea.vmem [#allocation2], %s4490_s28  ;;  %195 = sbr.rel (%p4492_p11) target bundleno = 30 (0x1e), region = 32 }
  0x18   : > { %s5749_s30 = smul.u32 432, %s188_s29 }
  0x1a   : > { %s6009_s7 = scalar_lea.vmem %s7513_s0, %s5749_s30 }
  0x1c   : > { %v5920_v0 = vmov 0.0  }
  0x1d   : > { %196 = vst [vmem:[#allocation4] sm:$0x1] %v5920_v0  ;;  %197 = vst [vmem:[#allocation6] sm:$0x1] %v5920_v0 }
  0x1e PF: > { %v230_v1 = vld [vmem:[%s7514_s1] sm:$0xf]  ;;  %vm328_vm0 = vcmask 1043456   ;;  %vm231_vm1 = vcmask 31744   ;;  %v6021_v3 = vld [vmem:[%s6009_s7 + $0xc8] sm:$0xff]  ;;  %v6030_v5 = vld [vmem:[%s6009_s7 + $0xd8] sm:$0xff] }
  0x1f   : > { %v6018_v2 = vld [vmem:[%s6009_s7 + $0xc0] sm:$0xff]  ;;  %5747 = vmatprep.subr.msk.mxu1 %vm328_vm0, %v230_v1  ;;  %5297 = vmatprep.subr.msk.mxu0 %vm328_vm0, %v230_v1  ;;  %v199_v7 = vld [vmem:[%s6009_s7 + $0x8] sm:$0xff]  ;;  %v6049_v10 = vld [vmem:[%s6009_s7 + $0xf0] sm:$0xff]  ;;  %s4381_s13 = sshll.u32 %s6011_s8, 4  ;;  %s7455_s23 = scalar_lea.sflag [#allocation3], %s180_s27  ;;  %s7449_s13 = int_to_ptr.vmem [resolvable:$true] %s4381_s13 }
  0x20   : > { %5323 = vmatprep.mubr.msk.f32.mxu1 %vm231_vm1, %v6018_v2  ;;  %v4526_v4 = vld [vmem:[%s7514_s1 + $0x4] sm:$0xf]  ;;  %5748 = vmatpush3.msk.msra.mxu1 %vm328_vm0, %v230_v1  ;;  %v4560_v8 = vld [vmem:[%s7514_s1 + $0x8] sm:$0xf]  ;;  %v6054_v11 = vld [vmem:[%s6009_s7 + $0x18] sm:$0xff]  ;;  %s5806_s28 = scalar_lea.vmem %s7449_s13, 4096 }
  0x21   : > { %v198_v6 = vld [vmem:[%s6009_s7] sm:$0xff]  ;;  %5324 = vmatmul.mubr.msk.f32.vlgmr.msra.gmra.mxu1 %vm231_vm1, %v6021_v3  ;;  %5347 = vmatprep.subr.msk.mxu1 %vm328_vm0, %v4526_v4  ;;  %v6067_v13 = vld [vmem:[%s6009_s7 + $0xf8] sm:$0xff]  ;;  %v6072_v14 = vld [vmem:[%s6009_s7 + $0x30] sm:$0xff]  ;;  %p5807_p12 = scmp.ne.s32.totalorder %s7449_s13, %s5806_s28  ;;  %s5921_s29 = smov [#allocation2]  }
  0x22   : > { %5348 = vmatpush3.msk.msra.mxu1 %vm328_vm0, %v4526_v4  ;;  %5326 = vmatprep.mubr.msk.f32.mxu1 %vm231_vm1, %v6030_v5  ;;  %v6046_v9 = vld [vmem:[%s6009_s7 + $0xe0] sm:$0xff]  ;;  %v6075_v15 = vld [vmem:[%s6009_s7 + $0x108] sm:$0xff]  ;;  %v6084_v16 = vld [vmem:[%s6009_s7 + $0x38] sm:$0xff]  ;;  %s5810_s30 = sshll.u32 %s5921_s29, 4  ;;  %s5811_s30 = int_to_ptr.vmem [resolvable:$false] %s5810_s30 }
  0x23   : > { %5298 = vmatpush3.msk.msra.mxu0 %vm328_vm0, %v230_v1  ;;  %5299 = vmatprep.mubr.msk.f32.mxu0 %vm231_vm1, %v198_v6  ;;  %v6062_v12 = vld [vmem:[%s6009_s7 + $0x20] sm:$0xff]  ;;  %v4626_v17 = vld [vmem:[%s7514_s1 + $0xc] sm:$0xf]  ;;  %v6092_v18 = vld [vmem:[%s6009_s7 + $0x110] sm:$0xff]  ;;  %p5808_p13 = pnand %p5807_p12, %p5991_p5  ;;  %s5812_s5 = scalar_lea.vmem %s5811_s30, 8192 }
  0x24   : > { %5300 = vmatmul.mubr.msk.f32.vlgmr.msra.gmra.mxu0 %vm231_vm1, %v199_v7  ;;  %5397 = vmatprep.subr.msk.mxu0 %vm328_vm0, %v4560_v8  ;;  %v6095_v19 = vld [vmem:[%s6009_s7 + $0x48] sm:$0xff]  ;;  %v6099_v20 = vld [vmem:[%s6009_s7 + $0x120] sm:$0xff]  ;;  %v4692_v21 = vld [vmem:[%s7514_s1 + $0x10] sm:$0xf]  ;;  %p5813_p1 = scmp.lt.s32.totalorder %s7449_s13, %s5811_s30  ;;  %p5814_p3 = scmp.lt.s32.totalorder %s5812_s5, %s5806_s28 }
  0x25   : > { %5327 = vmatmul.mubr.msk.f32.gmra.mxu1 %vm231_vm1, %v6046_v9  ;;  %5398 = vmatpush3.msk.msra.mxu0 %vm328_vm0, %v4560_v8  ;;  %v6111_v22 = vld [vmem:[%s6009_s7 + $0x50] sm:$0xff]  ;;  %v6116_v23 = vld [vmem:[%s6009_s7 + $0x128] sm:$0xff]  ;;  %v6119_v24 = vld [vmem:[%s6009_s7 + $0x60] sm:$0xff]  ;;  %p5809_p0 = pneg %p5808_p13 }
  0x26   : > { %5329 = vmatprep.mubr.msk.f32.mxu1 %vm231_vm1, %v6049_v10  ;;  %5302 = vmatprep.mubr.msk.f32.mxu0 %vm231_vm1, %v6054_v11  ;;  %v6123_v25 = vld [vmem:[%s6009_s7 + $0x138] sm:$0xff]  ;;  %v6132_v26 = vld [vmem:[%s6009_s7 + $0x68] sm:$0xff]  ;;  %v6137_v27 = vld [vmem:[%s6009_s7 + $0x140] sm:$0xff]  ;;  %p5815_p4 = por %p5814_p3, %p5813_p1 }
  0x27   : > { %5447 = vmatprep.subr.msk.mxu1 %vm328_vm0, %v4626_v17  ;;  %5497 = vmatprep.subr.msk.mxu0 %vm328_vm0, %v4692_v21  ;;  %v6140_v28 = vld [vmem:[%s6009_s7 + $0x78] sm:$0xff]  ;;  %v6143_v29 = vld [vmem:[%s6009_s7 + $0x150] sm:$0xff]  ;;  %v6152_v30 = vld [vmem:[%s6009_s7 + $0x80] sm:$0xff] }
  0x28   : > { %5303 = vmatmul.mubr.msk.f32.gmra.mxu0 %vm231_vm1, %v6062_v12  ;;  %v6157_v31 = vld [vmem:[%s6009_s7 + $0x158] sm:$0xff]  ;;  %v6160_v32 = vld [vmem:[%s6009_s7 + $0x90] sm:$0xff]  ;;  %v6163_v33 = vld [vmem:[%s6009_s7 + $0x168] sm:$0xff]  ;;  %p5816_p7 = pnand %p5815_p4, %p5809_p0 }
  0x29   : > { %5330 = vmatmul.mubr.msk.f32.gmra.mxu1 %vm231_vm1, %v6067_v13  ;;  %5305 = vmatprep.mubr.msk.f32.mxu0 %vm231_vm1, %v6072_v14  ;;  %7558 = vst [vmem:[#allocation9_spill] sm:$0xff] %v6163_v33  ;;  %v6172_v34 = vld [vmem:[%s6009_s7 + $0x98] sm:$0xff]  ;;  %v6177_v35 = vld [vmem:[%s6009_s7 + $0x170] sm:$0xff]  ;;  %v6180_v36 = vld [vmem:[%s6009_s7 + $0xa8] sm:$0xff] }
  0x2a   : > { %5332 = vmatprep.mubr.msk.f32.mxu1 %vm231_vm1, %v6075_v15  ;;  %7559 = vst [vmem:[#allocation10_spill] sm:$0xff] %v6177_v35  ;;  %v589_v37 = vld [vmem:[%s6009_s7 + $0x1] sm:$0xff]  ;;  %v6190_v38 = vld [vmem:[%s6009_s7 + $0xb0] sm:$0xff]  ;;  %v6196_v41 = vld [vmem:[%s6009_s7 + $0x19] sm:$0xff] }
  0x2b   : > { %v590_v39 = vld [vmem:[%s6009_s7 + $0x9] sm:$0xff]  ;;  %v6203_v42 = vld [vmem:[%s7514_s1 + $0x14] sm:$0xf]  ;;  %v6212_v44 = vld [vmem:[%s6009_s7 + $0x21] sm:$0xff] }
  0x2c   : > { %5306 = vmatmul.mubr.msk.f32.gmra.mxu0 %vm231_vm1, %v6084_v16  ;;  %v1043_v40 = vld [vmem:[%s6009_s7 + $0x2] sm:$0xff]  ;;  %v1044_v43 = vld [vmem:[%s6009_s7 + $0xa] sm:$0xff]  ;;  %v6218_v46 = vld [vmem:[%s6009_s7 + $0x1a] sm:$0xff] }
  0x2d   : > { %5333 = vmatmul.mubr.msk.f32.gmra.mxu1 %vm231_vm1, %v6092_v18  ;;  %5308 = vmatprep.mubr.msk.f32.mxu0 %vm231_vm1, %v6095_v19  ;;  %v6215_v45 = vld [vmem:[%s6009_s7 + $0x31] sm:$0xff]  ;;  %7560 = vst [vmem:[#allocation11_spill] sm:$0xff] %v6218_v46  ;;  %v6232_v48 = vld [vmem:[%s6009_s7 + $0x22] sm:$0xff]  ;;  %v6237_v49 = vld [vmem:[%s6009_s7 + $0x39] sm:$0xff] }
  0x2e   : > { %5335 = vmatprep.mubr.msk.f32.mxu1 %vm231_vm1, %v6099_v20  ;;  %v6226_v47 = vld [vmem:[%s7514_s1 + $0x18] sm:$0xf]  ;;  %7561 = vst [vmem:[#allocation12_spill] sm:$0xff] %v6232_v48  ;;  %v6245_v51 = vld [vmem:[%s6009_s7 + $0x49] sm:$0xff]  ;;  %v6267_v55 = vld [vmem:[%s6009_s7 + $0x61] sm:$0xff] }
  0x2f   : > { %v6242_v50 = vld [vmem:[%s6009_s7 + $0x32] sm:$0xff]  ;;  %v6256_v52 = vld [vmem:[%s6009_s7 + $0x3a] sm:$0xff]  ;;  %v6264_v54 = vld [vmem:[%s6009_s7 + $0x4a] sm:$0xff] }
  0x30   : > { %5309 = vmatmul.mubr.msk.f32.gmra.mxu0 %vm231_vm1, %v6111_v22  ;;  %7562 = vst [vmem:[#allocation13_spill] sm:$0xff] %v6242_v50  ;;  %7563 = vst [vmem:[#allocation14_spill] sm:$0xff] %v6256_v52  ;;  %v6261_v53 = vld [vmem:[%s6009_s7 + $0x51] sm:$0xff]  ;;  %v6281_v57 = vld [vmem:[%s6009_s7 + $0x69] sm:$0xff] }
  0x31   : > { %5336 = vmatmul.mubr.msk.f32.gmra.mxu1 %vm231_vm1, %v6116_v23  ;;  %5311 = vmatprep.mubr.msk.f32.mxu0 %vm231_vm1, %v6119_v24  ;;  %7564 = vst [vmem:[#allocation15_spill] sm:$0xff] %v6264_v54  ;;  %v6276_v56 = vld [vmem:[%s6009_s7 + $0x52] sm:$0xff]  ;;  %v6284_v58 = vld [vmem:[%s6009_s7 + $0x62] sm:$0xff]  ;;  %v6296_v60 = vld [vmem:[%s6009_s7 + $0x6a] sm:$0xff] }
  0x32   : > { %5338 = vmatprep.mubr.msk.f32.mxu1 %vm231_vm1, %v6123_v25  ;;  %7565 = vst [vmem:[#allocation16_spill] sm:$0xff] %v6276_v56  ;;  %7566 = vst [vmem:[#allocation17_spill] sm:$0xff] %v6284_v58  ;;  %v6287_v59 = vld [vmem:[%s6009_s7 + $0x79] sm:$0xff]  ;;  %v6301_v61 = vld [vmem:[%s6009_s7 + $0x81] sm:$0xff] }
  0x33   : > { %7567 = vst [vmem:[#allocation18_spill] sm:$0xff] %v6296_v60  ;;  %v6304_v62 = vld [vmem:[%s6009_s7 + $0x7a] sm:$0xff]  ;;  %v6307_v63 = vld [vmem:[%s6009_s7 + $0x91] sm:$0xff]  ;;  %v6316_v0 = vld [vmem:[%s6009_s7 + $0x82] sm:$0xff] }
  0x34   : > { %5312 = vmatmul.mubr.msk.f32.gmra.mxu0 %vm231_vm1, %v6132_v26  ;;  %7568 = vst [vmem:[#allocation19_spill] sm:$0xff] %v6304_v62  ;;  %7569 = vst [vmem:[#allocation20_spill] sm:$0xff] %v6316_v0  ;;  %v6321_v1 = vld [vmem:[%s6009_s7 + $0x99] sm:$0xff]  ;;  %v6327_v6 = vld [vmem:[%s6009_s7 + $0xa9] sm:$0xff] }
  0x35   : > { %5339 = vmatmul.mubr.msk.f32.gmra.mxu1 %vm231_vm1, %v6137_v27  ;;  %5314 = vmatprep.mubr.msk.f32.mxu0 %vm231_vm1, %v6140_v28  ;;  %v6324_v4 = vld [vmem:[%s6009_s7 + $0x92] sm:$0xff]  ;;  %v6336_v7 = vld [vmem:[%s6009_s7 + $0x9a] sm:$0xff] }
  0x36   : > { %5341 = vmatprep.mubr.msk.f32.mxu1 %vm231_vm1, %v6143_v29  ;;  %7570 = vst [vmem:[#allocation21_spill] sm:$0xff] %v6324_v4  ;;  %7571 = vst [vmem:[#allocation22_spill] sm:$0xff] %v6336_v7  ;;  %v6341_v8 = vld [vmem:[%s6009_s7 + $0xb1] sm:$0xff] }
  0x38   : > { %5315 = vmatmul.mubr.msk.f32.gmra.mxu0 %vm231_vm1, %v6152_v30 }
  0x39   : > { %5342 = vmatmul.mubr.msk.f32.gmra.mxu1 %vm231_vm1, %v6157_v31  ;;  %5317 = vmatprep.mubr.msk.f32.mxu0 %vm231_vm1, %v6160_v32 }
  0x3a   : > { %5344 = vmatprep.mubr.msk.f32.mxu1 %vm231_vm1, %v6163_v33  ;;  %v6504_v33 = vld [vmem:[%s6009_s7 + $0x16a] sm:$0xff] }
  0x3c   : > { %5318 = vmatmul.mubr.msk.f32.gmra.mxu0 %vm231_vm1, %v6172_v34 }
  0x3d   : > { %5345 = vmatmul.mubr.msk.f32.gmra.mxu1 %vm231_vm1, %v6177_v35  ;;  %5320 = vmatprep.mubr.msk.f32.mxu0 %vm231_vm1, %v6180_v36  ;;  %v6487_v35 = vld [vmem:[%s6009_s7 + $0x169] sm:$0xff] }
  0x3e   : > { %5349 = vmatprep.mubr.msk.f32.mxu1 %vm231_vm1, %v589_v37  ;;  %v6356_v37 = vld [vmem:[%s6009_s7 + $0xb2] sm:$0xff] }
  0x3f   : > { %7573 = vst [vmem:[#allocation24_spill] sm:$0xff] %v6356_v37 }
  0x40   : > { %5321 = vmatmul.mubr.msk.f32.gmra.mxu0 %vm231_vm1, %v6190_v38 }
  0x41   : > { %5350 = vmatmul.mubr.msk.f32.vlgmr.msra.gmra.mxu1 %vm231_vm1, %v590_v39  ;;  %5399 = vmatprep.mubr.msk.f32.mxu0 %vm231_vm1, %v1043_v40  ;;  %v6361_v39 = vld [vmem:[%s6009_s7 + $0xc9] sm:$0xff] }
  0x42   : > { %5448 = vmatpush3.msk.msra.mxu1 %vm328_vm0, %v4626_v17  ;;  %5352 = vmatprep.mubr.msk.f32.mxu1 %vm231_vm1, %v6196_v41  ;;  %v6344_v17 = vld [vmem:[%s6009_s7 + $0xaa] sm:$0xff]  ;;  %v6364_v40 = vld [vmem:[%s6009_s7 + $0xc2] sm:$0xff] }
  0x43   : > { %5547 = vmatprep.subr.msk.mxu1 %vm328_vm0, %v6203_v42  ;;  %7572 = vst [vmem:[#allocation23_spill] sm:$0xff] %v6344_v17  ;;  %7574 = vst [vmem:[#allocation25_spill] sm:$0xff] %v6364_v40 }
  0x44   : > { %5400 = vmatmul.mubr.msk.f32.vlgmr.msra.gmra.mxu0 %vm231_vm1, %v1044_v43  ;;  %v6367_v43 = vld [vmem:[%s6009_s7 + $0xd9] sm:$0xff] }
  0x45   : > { %5353 = vmatmul.mubr.msk.f32.gmra.mxu1 %vm231_vm1, %v6212_v44  ;;  %5498 = vmatpush3.msk.msra.mxu0 %vm328_vm0, %v4692_v21  ;;  %v6347_v21 = vld [vmem:[%s6009_s7 + $0xc1] sm:$0xff] }
  0x46   : > { %5355 = vmatprep.mubr.msk.f32.mxu1 %vm231_vm1, %v6215_v45  ;;  %5402 = vmatprep.mubr.msk.f32.mxu0 %vm231_vm1, %v6218_v46  ;;  %v6484_v46 = vld [vmem:[%s6009_s7 + $0x152] sm:$0xff] }
  0x47   : > { %5597 = vmatprep.subr.msk.mxu0 %vm328_vm0, %v6226_v47  ;;  %7586 = vst [vmem:[#allocation37_spill] sm:$0xff] %v6484_v46 }
  0x48   : > { %5403 = vmatmul.mubr.msk.f32.gmra.mxu0 %vm231_vm1, %v6232_v48  ;;  %v6467_v48 = vld [vmem:[%s6009_s7 + $0x151] sm:$0xff] }
  0x49   : > { %5356 = vmatmul.mubr.msk.f32.gmra.mxu1 %vm231_vm1, %v6237_v49  ;;  %5405 = vmatprep.mubr.msk.f32.mxu0 %vm231_vm1, %v6242_v50  ;;  %v6464_v50 = vld [vmem:[%s6009_s7 + $0x13a] sm:$0xff] }
  0x4a   : > { %5358 = vmatprep.mubr.msk.f32.mxu1 %vm231_vm1, %v6245_v51  ;;  %7584 = vst [vmem:[#allocation35_spill] sm:$0xff] %v6464_v50 }
  0x4c   : > { %5406 = vmatmul.mubr.msk.f32.gmra.mxu0 %vm231_vm1, %v6256_v52  ;;  %v6447_v52 = vld [vmem:[%s6009_s7 + $0x139] sm:$0xff] }
  0x4d   : > { %5359 = vmatmul.mubr.msk.f32.gmra.mxu1 %vm231_vm1, %v6261_v53  ;;  %5408 = vmatprep.mubr.msk.f32.mxu0 %vm231_vm1, %v6264_v54  ;;  %v6444_v54 = vld [vmem:[%s6009_s7 + $0x122] sm:$0xff] }
  0x4e   : > { %5361 = vmatprep.mubr.msk.f32.mxu1 %vm231_vm1, %v6267_v55  ;;  %7582 = vst [vmem:[#allocation33_spill] sm:$0xff] %v6444_v54 }
  0x50   : > { %5409 = vmatmul.mubr.msk.f32.gmra.mxu0 %vm231_vm1, %v6276_v56  ;;  %v6427_v56 = vld [vmem:[%s6009_s7 + $0x121] sm:$0xff] }
  0x51   : > { %5362 = vmatmul.mubr.msk.f32.gmra.mxu1 %vm231_vm1, %v6281_v57  ;;  %5411 = vmatprep.mubr.msk.f32.mxu0 %vm231_vm1, %v6284_v58  ;;  %v6424_v58 = vld [vmem:[%s6009_s7 + $0x10a] sm:$0xff] }
  0x52   : > { %5364 = vmatprep.mubr.msk.f32.mxu1 %vm231_vm1, %v6287_v59  ;;  %7580 = vst [vmem:[#allocation31_spill] sm:$0xff] %v6424_v58 }
  0x54   : > { %5412 = vmatmul.mubr.msk.f32.gmra.mxu0 %vm231_vm1, %v6296_v60  ;;  %v6407_v60 = vld [vmem:[%s6009_s7 + $0x109] sm:$0xff] }
  0x55   : > { %5365 = vmatmul.mubr.msk.f32.gmra.mxu1 %vm231_vm1, %v6301_v61  ;;  %5414 = vmatprep.mubr.msk.f32.mxu0 %vm231_vm1, %v6304_v62  ;;  %v6404_v62 = vld [vmem:[%s6009_s7 + $0xf2] sm:$0xff] }
  0x56   : > { %5367 = vmatprep.mubr.msk.f32.mxu1 %vm231_vm1, %v6307_v63  ;;  %7578 = vst [vmem:[#allocation29_spill] sm:$0xff] %v6404_v62 }
  0x58   : > { %5415 = vmatmul.mubr.msk.f32.gmra.mxu0 %vm231_vm1, %v6316_v0  ;;  %v6387_v0 = vld [vmem:[%s6009_s7 + $0xf1] sm:$0xff] }
  0x59   : > { %5368 = vmatmul.mubr.msk.f32.gmra.mxu1 %vm231_vm1, %v6321_v1  ;;  %5417 = vmatprep.mubr.msk.f32.mxu0 %vm231_vm1, %v6324_v4  ;;  %v6384_v4 = vld [vmem:[%s6009_s7 + $0xda] sm:$0xff] }
  0x5a   : > { %5370 = vmatprep.mubr.msk.f32.mxu1 %vm231_vm1, %v6327_v6  ;;  %7576 = vst [vmem:[#allocation27_spill] sm:$0xff] %v6384_v4 }
  0x5c   : > { %5418 = vmatmul.mubr.msk.f32.gmra.mxu0 %vm231_vm1, %v6336_v7  ;;  %v6381_v7 = vld [vmem:[%s6009_s7 + $0xe1] sm:$0xff] }
  0x5d   : > { %5371 = vmatmul.mubr.msk.f32.gmra.mxu1 %vm231_vm1, %v6341_v8  ;;  %5420 = vmatprep.mubr.msk.f32.mxu0 %vm231_vm1, %v6344_v17  ;;  %v6376_v17 = vld [vmem:[%s6009_s7 + $0xca] sm:$0xff] }
  0x5e   : > { %5373 = vmatprep.mubr.msk.f32.mxu1 %vm231_vm1, %v6347_v21  ;;  %7575 = vst [vmem:[#allocation26_spill] sm:$0xff] %v6376_v17 }
  0x60   : > { %5421 = vmatmul.mubr.msk.f32.gmra.mxu0 %vm231_vm1, %v6356_v37  ;;  %v6401_v37 = vld [vmem:[%s6009_s7 + $0xf9] sm:$0xff] }
  0x61   : > { %5374 = vmatmul.mubr.msk.f32.gmra.mxu1 %vm231_vm1, %v6361_v39  ;;  %5423 = vmatprep.mubr.msk.f32.mxu0 %vm231_vm1, %v6364_v40  ;;  %v6396_v40 = vld [vmem:[%s6009_s7 + $0xe2] sm:$0xff] }
  0x62   : > { %5376 = vmatprep.mubr.msk.f32.mxu1 %vm231_vm1, %v6367_v43  ;;  %7577 = vst [vmem:[#allocation28_spill] sm:$0xff] %v6396_v40 }
  0x64   : > { %5424 = vmatmul.mubr.msk.f32.gmra.mxu0 %vm231_vm1, %v6376_v17  ;;  %v6421_v17 = vld [vmem:[%s6009_s7 + $0x111] sm:$0xff] }
  0x65   : > { %5377 = vmatmul.mubr.msk.f32.gmra.mxu1 %vm231_vm1, %v6381_v7  ;;  %5426 = vmatprep.mubr.msk.f32.mxu0 %vm231_vm1, %v6384_v4  ;;  %v6416_v4 = vld [vmem:[%s6009_s7 + $0xfa] sm:$0xff] }
  0x66   : > { %5379 = vmatprep.mubr.msk.f32.mxu1 %vm231_vm1, %v6387_v0  ;;  %7579 = vst [vmem:[#allocation30_spill] sm:$0xff] %v6416_v4 }
  0x68   : > { %5427 = vmatmul.mubr.msk.f32.gmra.mxu0 %vm231_vm1, %v6396_v40  ;;  %v6441_v40 = vld [vmem:[%s6009_s7 + $0x129] sm:$0xff] }
  0x69   : > { %5380 = vmatmul.mubr.msk.f32.gmra.mxu1 %vm231_vm1, %v6401_v37  ;;  %5429 = vmatprep.mubr.msk.f32.mxu0 %vm231_vm1, %v6404_v62  ;;  %v6436_v62 = vld [vmem:[%s6009_s7 + $0x112] sm:$0xff] }
  0x6a   : > { %5382 = vmatprep.mubr.msk.f32.mxu1 %vm231_vm1, %v6407_v60  ;;  %7581 = vst [vmem:[#allocation32_spill] sm:$0xff] %v6436_v62 }
  0x6c   : > { %5430 = vmatmul.mubr.msk.f32.gmra.mxu0 %vm231_vm1, %v6416_v4  ;;  %v6461_v4 = vld [vmem:[%s6009_s7 + $0x141] sm:$0xff] }
  0x6d   : > { %5383 = vmatmul.mubr.msk.f32.gmra.mxu1 %vm231_vm1, %v6421_v17  ;;  %5432 = vmatprep.mubr.msk.f32.mxu0 %vm231_vm1, %v6424_v58  ;;  %v6456_v58 = vld [vmem:[%s6009_s7 + $0x12a] sm:$0xff] }
  0x6e   : > { %5385 = vmatprep.mubr.msk.f32.mxu1 %vm231_vm1, %v6427_v56  ;;  %7583 = vst [vmem:[#allocation34_spill] sm:$0xff] %v6456_v58 }
  0x70   : > { %5433 = vmatmul.mubr.msk.f32.gmra.mxu0 %vm231_vm1, %v6436_v62  ;;  %v6481_v62 = vld [vmem:[%s6009_s7 + $0x159] sm:$0xff] }
  0x71   : > { %5386 = vmatmul.mubr.msk.f32.gmra.mxu1 %vm231_vm1, %v6441_v40  ;;  %5435 = vmatprep.mubr.msk.f32.mxu0 %vm231_vm1, %v6444_v54  ;;  %v6476_v54 = vld [vmem:[%s6009_s7 + $0x142] sm:$0xff] }
  0x72   : > { %5388 = vmatprep.mubr.msk.f32.mxu1 %vm231_vm1, %v6447_v52  ;;  %7585 = vst [vmem:[#allocation36_spill] sm:$0xff] %v6476_v54 }
  0x74   : > { %5436 = vmatmul.mubr.msk.f32.gmra.mxu0 %vm231_vm1, %v6456_v58  ;;  %v6501_v58 = vld [vmem:[%s6009_s7 + $0x171] sm:$0xff] }
  0x75   : > { %5389 = vmatmul.mubr.msk.f32.gmra.mxu1 %vm231_vm1, %v6461_v4  ;;  %5438 = vmatprep.mubr.msk.f32.mxu0 %vm231_vm1, %v6464_v50  ;;  %v6496_v50 = vld [vmem:[%s6009_s7 + $0x15a] sm:$0xff] }
  0x76   : > { %5391 = vmatprep.mubr.msk.f32.mxu1 %vm231_vm1, %v6467_v48 }
  0x78   : > { %5439 = vmatmul.mubr.msk.f32.gmra.mxu0 %vm231_vm1, %v6476_v54  ;;  %v6513_v54 = vld [vmem:[%s6009_s7 + $0x172] sm:$0xff] }
  0x79   : > { %5392 = vmatmul.mubr.msk.f32.gmra.mxu1 %vm231_vm1, %v6481_v62  ;;  %5441 = vmatprep.mubr.msk.f32.mxu0 %vm231_vm1, %v6484_v46  ;;  %v6522_v46 = vld [vmem:[%s7514_s1 + $0x1c] sm:$0xf] }
  0x7a   : > { %5394 = vmatprep.mubr.msk.f32.mxu1 %vm231_vm1, %v6487_v35 }
  0x7c   : > { %5442 = vmatmul.mubr.msk.f32.gmra.mxu0 %vm231_vm1, %v6496_v50 }
  0x7d   : > { %5395 = vmatmul.mubr.msk.f32.gmra.mxu1 %vm231_vm1, %v6501_v58  ;;  %5444 = vmatprep.mubr.msk.f32.mxu0 %vm231_vm1, %v6504_v33 }
  0x7e   : > { %5449 = vmatprep.mubr.msk.f32.mxu1 %vm231_vm1, %v6054_v11  ;;  %v6539_v11 = vld [vmem:[%s7514_s1 + $0x20] sm:$0xf] }
  0x80   : > { %5445 = vmatmul.mubr.msk.f32.gmra.mxu0 %vm231_vm1, %v6513_v54 }
  0x81   : > { %5450 = vmatmul.mubr.msk.f32.vlgmr.msra.gmra.mxu1 %vm231_vm1, %v6062_v12  ;;  %5499 = vmatprep.mubr.msk.f32.mxu0 %vm231_vm1, %v6196_v41  ;;  %v7587_v12 = vld [vmem:[#allocation9_spill] sm:$0xff] }
  0x82   : > { %5548 = vmatpush3.msk.msra.mxu1 %vm328_vm0, %v6203_v42  ;;  %5452 = vmatprep.mubr.msk.f32.mxu1 %vm231_vm1, %v6072_v14  ;;  %v6648_v41 = vld [vmem:[%s6009_s7 + $0x180] sm:$0xff]  ;;  %v7588_v42 = vld [vmem:[#allocation10_spill] sm:$0xff] }
  0x83   : > { %5647 = vmatprep.subr.msk.mxu1 %vm328_vm0, %v6522_v46 }
  0x84   : > { %5500 = vmatmul.mubr.msk.f32.vlgmr.msra.gmra.mxu0 %vm231_vm1, %v6212_v44  ;;  %v6659_v44 = vld [vmem:[%s6009_s7 + $0x188] sm:$0xff] }
  0x85   : > { %5453 = vmatmul.mubr.msk.f32.gmra.mxu1 %vm231_vm1, %v6084_v16  ;;  %5598 = vmatpush3.msk.msra.mxu0 %vm328_vm0, %v6226_v47  ;;  %v6662_v47 = vld [vmem:[%s6009_s7 + $0x181] sm:$0xff] }
  0x86   : > { %5455 = vmatprep.mubr.msk.f32.mxu1 %vm231_vm1, %v6095_v19  ;;  %5502 = vmatprep.mubr.msk.f32.mxu0 %vm231_vm1, %v6215_v45 }
  0x87   : > { %5697 = vmatprep.subr.msk.mxu0 %vm328_vm0, %v6539_v11 }
  0x88   : > { %5503 = vmatmul.mubr.msk.f32.gmra.mxu0 %vm231_vm1, %v6237_v49 }
  0x89   : > { %5456 = vmatmul.mubr.msk.f32.gmra.mxu1 %vm231_vm1, %v6111_v22  ;;  %5505 = vmatprep.mubr.msk.f32.mxu0 %vm231_vm1, %v6245_v51 }
  0x8a   : > { %5458 = vmatprep.mubr.msk.f32.mxu1 %vm231_vm1, %v6119_v24 }
  0x8c   : > { %5506 = vmatmul.mubr.msk.f32.gmra.mxu0 %vm231_vm1, %v6261_v53 }
  0x8d   : > { %5459 = vmatmul.mubr.msk.f32.gmra.mxu1 %vm231_vm1, %v6132_v26  ;;  %5508 = vmatprep.mubr.msk.f32.mxu0 %vm231_vm1, %v6267_v55 }
  0x8e   : > { %5461 = vmatprep.mubr.msk.f32.mxu1 %vm231_vm1, %v6140_v28 }
  0x90   : > { %5509 = vmatmul.mubr.msk.f32.gmra.mxu0 %vm231_vm1, %v6281_v57 }
  0x91   : > { %5462 = vmatmul.mubr.msk.f32.gmra.mxu1 %vm231_vm1, %v6152_v30  ;;  %5511 = vmatprep.mubr.msk.f32.mxu0 %vm231_vm1, %v6287_v59 }
  0x92   : > { %5464 = vmatprep.mubr.msk.f32.mxu1 %vm231_vm1, %v6160_v32 }
  0x94   : > { %5512 = vmatmul.mubr.msk.f32.gmra.mxu0 %vm231_vm1, %v6301_v61 }
  0x95   : > { %5465 = vmatmul.mubr.msk.f32.gmra.mxu1 %vm231_vm1, %v6172_v34  ;;  %5514 = vmatprep.mubr.msk.f32.mxu0 %vm231_vm1, %v6307_v63 }
  0x96   : > { %5467 = vmatprep.mubr.msk.f32.mxu1 %vm231_vm1, %v6180_v36 }
  0x98   : > { %5515 = vmatmul.mubr.msk.f32.gmra.mxu0 %vm231_vm1, %v6321_v1 }
  0x99   : > { %5468 = vmatmul.mubr.msk.f32.gmra.mxu1 %vm231_vm1, %v6190_v38  ;;  %5517 = vmatprep.mubr.msk.f32.mxu0 %vm231_vm1, %v6327_v6 }
  0x9a   : > { %5470 = vmatprep.mubr.msk.f32.mxu1 %vm231_vm1, %v6018_v2 }
  0x9c   : > { %5518 = vmatmul.mubr.msk.f32.gmra.mxu0 %vm231_vm1, %v6341_v8 }
  0x9d   : > { %5471 = vmatmul.mubr.msk.f32.gmra.mxu1 %vm231_vm1, %v6021_v3  ;;  %5520 = vmatprep.mubr.msk.f32.mxu0 %vm231_vm1, %v6347_v21  ;;  %v7610_v21 = vld [vmem:[#allocation32_spill] sm:$0xff] }
  0x9e   : > { %5473 = vmatprep.mubr.msk.f32.mxu1 %vm231_vm1, %v6030_v5 }
  0xa0   : > { %5521 = vmatmul.mubr.msk.f32.gmra.mxu0 %vm231_vm1, %v6361_v39 }
  0xa1   : > { %5474 = vmatmul.mubr.msk.f32.gmra.mxu1 %vm231_vm1, %v6046_v9  ;;  %5523 = vmatprep.mubr.msk.f32.mxu0 %vm231_vm1, %v6367_v43  ;;  %v7612_v43 = vld [vmem:[#allocation34_spill] sm:$0xff] }
  0xa2   : > { %5476 = vmatprep.mubr.msk.f32.mxu1 %vm231_vm1, %v6049_v10 }
  0xa4   : > { %5524 = vmatmul.mubr.msk.f32.gmra.mxu0 %vm231_vm1, %v6381_v7 }
  0xa5   : > { %5477 = vmatmul.mubr.msk.f32.gmra.mxu1 %vm231_vm1, %v6067_v13  ;;  %5526 = vmatprep.mubr.msk.f32.mxu0 %vm231_vm1, %v6387_v0 }
  0xa6   : > { %5479 = vmatprep.mubr.msk.f32.mxu1 %vm231_vm1, %v6075_v15 }
  0xa8   : > { %5527 = vmatmul.mubr.msk.f32.gmra.mxu0 %vm231_vm1, %v6401_v37 }
  0xa9   : > { %5480 = vmatmul.mubr.msk.f32.gmra.mxu1 %vm231_vm1, %v6092_v18  ;;  %5529 = vmatprep.mubr.msk.f32.mxu0 %vm231_vm1, %v6407_v60  ;;  %v7593_v60 = vld [vmem:[#allocation15_spill] sm:$0xff] }
  0xaa   : > { %5482 = vmatprep.mubr.msk.f32.mxu1 %vm231_vm1, %v6099_v20 }
  0xac   : > { %5530 = vmatmul.mubr.msk.f32.gmra.mxu0 %vm231_vm1, %v6421_v17 }
  0xad   : > { %5483 = vmatmul.mubr.msk.f32.gmra.mxu1 %vm231_vm1, %v6116_v23  ;;  %5532 = vmatprep.mubr.msk.f32.mxu0 %vm231_vm1, %v6427_v56  ;;  %v7591_v56 = vld [vmem:[#allocation13_spill] sm:$0xff] }
  0xae   : > { %5485 = vmatprep.mubr.msk.f32.mxu1 %vm231_vm1, %v6123_v25 }
  0xb0   : > { %5533 = vmatmul.mubr.msk.f32.gmra.mxu0 %vm231_vm1, %v6441_v40 }
  0xb1   : > { %5486 = vmatmul.mubr.msk.f32.gmra.mxu1 %vm231_vm1, %v6137_v27  ;;  %5535 = vmatprep.mubr.msk.f32.mxu0 %vm231_vm1, %v6447_v52  ;;  %v7589_v52 = vld [vmem:[#allocation11_spill] sm:$0xff] }
  0xb2   : > { %5488 = vmatprep.mubr.msk.f32.mxu1 %vm231_vm1, %v6143_v29 }
  0xb4   : > { %5536 = vmatmul.mubr.msk.f32.gmra.mxu0 %vm231_vm1, %v6461_v4  ;;  %v7609_v4 = vld [vmem:[#allocation31_spill] sm:$0xff] }
  0xb5   : > { %5489 = vmatmul.mubr.msk.f32.gmra.mxu1 %vm231_vm1, %v6157_v31  ;;  %5538 = vmatprep.mubr.msk.f32.mxu0 %vm231_vm1, %v6467_v48  ;;  %v6671_v48 = vld [vmem:[%s6009_s7 + $0x189] sm:$0xff] }
  0xb6   : > { %5491 = vmatprep.mubr.msk.f32.mxu1 %vm231_vm1, %v7587_v12 }
  0xb8   : > { %5539 = vmatmul.mubr.msk.f32.gmra.mxu0 %vm231_vm1, %v6481_v62 }
  0xb9   : > { %5492 = vmatmul.mubr.msk.f32.gmra.mxu1 %vm231_vm1, %v7588_v42  ;;  %5541 = vmatprep.mubr.msk.f32.mxu0 %vm231_vm1, %v6487_v35  ;;  %v7590_v35 = vld [vmem:[#allocation12_spill] sm:$0xff] }
  0xba   : > { %5494 = vmatprep.mubr.msk.f32.mxu1 %vm231_vm1, %v6648_v41 }
  0xbc   : > { %5542 = vmatmul.mubr.msk.f32.gmra.mxu0 %vm231_vm1, %v6501_v58  ;;  %v7592_v58 = vld [vmem:[#allocation14_spill] sm:$0xff] }
  0xbd   : > { %5495 = vmatmul.mubr.msk.f32.gmra.mxu1 %vm231_vm1, %v6659_v44  ;;  %5544 = vmatprep.mubr.msk.f32.mxu0 %vm231_vm1, %v6662_v47 }
  0xbe   : > { %5549 = vmatprep.mubr.msk.f32.mxu1 %vm231_vm1, %v7589_v52 }
  0xc0   : > { %5545 = vmatmul.mubr.msk.f32.gmra.mxu0 %vm231_vm1, %v6671_v48 }
  0xc1   : > { %5550 = vmatmul.mubr.msk.f32.vlgmr.msra.gmra.mxu1 %vm231_vm1, %v7590_v35  ;;  %5599 = vmatprep.mubr.msk.f32.mxu0 %vm231_vm1, %v6072_v14  ;;  %v7594_v14 = vld [vmem:[#allocation16_spill] sm:$0xff] }
  0xc2   : > { %5648 = vmatpush3.msk.msra.mxu1 %vm328_vm0, %v6522_v46  ;;  %5552 = vmatprep.mubr.msk.f32.mxu1 %vm231_vm1, %v7591_v56  ;;  %v7596_v46 = vld [vmem:[#allocation18_spill] sm:$0xff] }
  0xc4   : > { %5600 = vmatmul.mubr.msk.f32.vlgmr.msra.gmra.mxu0 %vm231_vm1, %v6084_v16  ;;  %v7595_v16 = vld [vmem:[#allocation17_spill] sm:$0xff] }
  0xc5   : > { %5553 = vmatmul.mubr.msk.f32.gmra.mxu1 %vm231_vm1, %v7592_v58  ;;  %5698 = vmatpush3.msk.msra.mxu0 %vm328_vm0, %v6539_v11 }
  0xc6   : > { %5555 = vmatprep.mubr.msk.f32.mxu1 %vm231_vm1, %v7593_v60  ;;  %5602 = vmatprep.mubr.msk.f32.mxu0 %vm231_vm1, %v6095_v19  ;;  %v7597_v19 = vld [vmem:[#allocation19_spill] sm:$0xff] }
  0xc8   : > { %5603 = vmatmul.mubr.msk.f32.gmra.mxu0 %vm231_vm1, %v6111_v22  ;;  %v7598_v22 = vld [vmem:[#allocation20_spill] sm:$0xff] }
  0xc9   : > { %5556 = vmatmul.mubr.msk.f32.gmra.mxu1 %vm231_vm1, %v7594_v14  ;;  %5605 = vmatprep.mubr.msk.f32.mxu0 %vm231_vm1, %v6119_v24  ;;  %v7599_v24 = vld [vmem:[#allocation21_spill] sm:$0xff] }
  0xca   : > { %5558 = vmatprep.mubr.msk.f32.mxu1 %vm231_vm1, %v7595_v16 }
  0xcc   : > { %5606 = vmatmul.mubr.msk.f32.gmra.mxu0 %vm231_vm1, %v6132_v26  ;;  %v7600_v26 = vld [vmem:[#allocation22_spill] sm:$0xff] }
  0xcd   : > { %5559 = vmatmul.mubr.msk.f32.gmra.mxu1 %vm231_vm1, %v7596_v46  ;;  %5608 = vmatprep.mubr.msk.f32.mxu0 %vm231_vm1, %v6140_v28  ;;  %v7601_v28 = vld [vmem:[#allocation23_spill] sm:$0xff] }
  0xce   : > { %5561 = vmatprep.mubr.msk.f32.mxu1 %vm231_vm1, %v7597_v19 }
  0xd0   : > { %5609 = vmatmul.mubr.msk.f32.gmra.mxu0 %vm231_vm1, %v6152_v30  ;;  %v7602_v30 = vld [vmem:[#allocation24_spill] sm:$0xff] }
  0xd1   : > { %5562 = vmatmul.mubr.msk.f32.gmra.mxu1 %vm231_vm1, %v7598_v22  ;;  %5611 = vmatprep.mubr.msk.f32.mxu0 %vm231_vm1, %v6160_v32  ;;  %v7603_v32 = vld [vmem:[#allocation25_spill] sm:$0xff]  ;;  %v7614_v22 = vld [vmem:[#allocation36_spill] sm:$0xff] }
  0xd2   : > { %5564 = vmatprep.mubr.msk.f32.mxu1 %vm231_vm1, %v7599_v24 }
  0xd4   : > { %5612 = vmatmul.mubr.msk.f32.gmra.mxu0 %vm231_vm1, %v6172_v34  ;;  %v7604_v34 = vld [vmem:[#allocation26_spill] sm:$0xff] }
  0xd5   : > { %5565 = vmatmul.mubr.msk.f32.gmra.mxu1 %vm231_vm1, %v7600_v26  ;;  %5614 = vmatprep.mubr.msk.f32.mxu0 %vm231_vm1, %v6180_v36  ;;  %v7605_v36 = vld [vmem:[#allocation27_spill] sm:$0xff] }
  0xd6   : > { %5567 = vmatprep.mubr.msk.f32.mxu1 %vm231_vm1, %v7601_v28 }
  0xd8   : > { %5615 = vmatmul.mubr.msk.f32.gmra.mxu0 %vm231_vm1, %v6190_v38 }
  0xd9   : > { %5568 = vmatmul.mubr.msk.f32.gmra.mxu1 %vm231_vm1, %v7602_v30  ;;  %5617 = vmatprep.mubr.msk.f32.mxu0 %vm231_vm1, %v6018_v2  ;;  %v7606_v2 = vld [vmem:[#allocation28_spill] sm:$0xff] }
  0xda   : > { %5570 = vmatprep.mubr.msk.f32.mxu1 %vm231_vm1, %v7603_v32  ;;  %v6836_v32 = vld [vmem:[%s6009_s7 + $0x182] sm:$0xff] }
  0xdc   : > { %5618 = vmatmul.mubr.msk.f32.gmra.mxu0 %vm231_vm1, %v6021_v3  ;;  %v7607_v3 = vld [vmem:[#allocation29_spill] sm:$0xff] }
  0xdd   : > { %5571 = vmatmul.mubr.msk.f32.gmra.mxu1 %vm231_vm1, %v7604_v34  ;;  %5620 = vmatprep.mubr.msk.f32.mxu0 %vm231_vm1, %v6030_v5 }
  0xde   : > { %5573 = vmatprep.mubr.msk.f32.mxu1 %vm231_vm1, %v7605_v36 }
  0xe0   : > { %5621 = vmatmul.mubr.msk.f32.gmra.mxu0 %vm231_vm1, %v6046_v9  ;;  %v7608_v9 = vld [vmem:[#allocation30_spill] sm:$0xff] }
  0xe1   : > { %v6745_v38 = vpop.f32.mrf.mxu1  ;;  %5574 = vmatmul.mubr.msk.f32.gmra.mxu1 %vm231_vm1, %v7606_v2  ;;  %5623 = vmatprep.mubr.msk.f32.mxu0 %vm231_vm1, %v6049_v10 }
  0xe2   : > { %5576 = vmatprep.mubr.msk.f32.mxu1 %vm231_vm1, %v7607_v3 }
  0xe3   : > { %v6753_v62 = vpop.f32.mrf.mxu1 }
  0xe4   : > { %v6755_v5 = vpop.f32.mrf.mxu0  ;;  %5624 = vmatmul.mubr.msk.f32.gmra.mxu0 %vm231_vm1, %v6067_v13 }
  0xe5   : > { %v6759_v0 = vpop.f32.mrf.mxu1  ;;  %5577 = vmatmul.mubr.msk.f32.gmra.mxu1 %vm231_vm1, %v7608_v9  ;;  %5626 = vmatprep.mubr.msk.f32.mxu0 %vm231_vm1, %v6075_v15  ;;  %v7611_v15 = vld [vmem:[#allocation33_spill] sm:$0xff] }
  0xe6   : > { %5579 = vmatprep.mubr.msk.f32.mxu1 %vm231_vm1, %v7609_v4  ;;  %v6767_v10 = vpop.f32.mrf.mxu0 }
  0xe7   : > { %v6769_v7 = vpop.f32.mrf.mxu1 }
  0xe8   : > { %v6771_v17 = vpop.f32.mrf.mxu0  ;;  %5627 = vmatmul.mubr.msk.f32.gmra.mxu0 %vm231_vm1, %v6092_v18 }
  0xe9   : > { %v6775_v13 = vpop.f32.mrf.mxu1  ;;  %5580 = vmatmul.mubr.msk.f32.gmra.mxu1 %vm231_vm1, %v7610_v21  ;;  %5629 = vmatprep.mubr.msk.f32.mxu0 %vm231_vm1, %v6099_v20  ;;  %v7613_v20 = vld [vmem:[#allocation35_spill] sm:$0xff] }
  0xea   : > { %5582 = vmatprep.mubr.msk.f32.mxu1 %vm231_vm1, %v7611_v15  ;;  %v6783_v37 = vpop.f32.mrf.mxu0 }
  0xeb   : > { %v6785_v39 = vpop.f32.mrf.mxu1 }
  0xec   : > { %v6787_v40 = vpop.f32.mrf.mxu0  ;;  %5630 = vmatmul.mubr.msk.f32.gmra.mxu0 %vm231_vm1, %v6116_v23 }
  0xed   : > { %v6791_v18 = vpop.f32.mrf.mxu1  ;;  %5583 = vmatmul.mubr.msk.f32.gmra.mxu1 %vm231_vm1, %v7612_v43  ;;  %5632 = vmatprep.mubr.msk.f32.mxu0 %vm231_vm1, %v6123_v25  ;;  %v7615_v25 = vld [vmem:[#allocation37_spill] sm:$0xff] }
  0xee   : > { %5585 = vmatprep.mubr.msk.f32.mxu1 %vm231_vm1, %v7613_v20  ;;  %v6799_v11 = vpop.f32.mrf.mxu0 }
  0xef   : > { %v6801_v52 = vpop.f32.mrf.mxu1 }
  0xf0   : > { %v6803_v35 = vpop.f32.mrf.mxu0  ;;  %5633 = vmatmul.mubr.msk.f32.gmra.mxu0 %vm231_vm1, %v6137_v27 }
  0xf1   : > { %v6807_v23 = vpop.f32.mrf.mxu1  ;;  %5586 = vmatmul.mubr.msk.f32.gmra.mxu1 %vm231_vm1, %v7614_v22  ;;  %5635 = vmatprep.mubr.msk.f32.mxu0 %vm231_vm1, %v6143_v29 }
  0xf2   : > { %5588 = vmatprep.mubr.msk.f32.mxu1 %vm231_vm1, %v7615_v25  ;;  %v6815_v24 = vpop.f32.mrf.mxu0 }
  0xf3   : > { %v6817_v26 = vpop.f32.mrf.mxu1 }
  0xf4   : > { %v6819_v28 = vpop.f32.mrf.mxu0  ;;  %5636 = vmatmul.mubr.msk.f32.gmra.mxu0 %vm231_vm1, %v6157_v31 }
  0xf5   : > { %v6823_v27 = vpop.f32.mrf.mxu1  ;;  %5589 = vmatmul.mubr.msk.f32.gmra.mxu1 %vm231_vm1, %v6496_v50  ;;  %5638 = vmatprep.mubr.msk.f32.mxu0 %vm231_vm1, %v7587_v12  ;;  %v4822_v12 = vld [vmem:[%s6009_s7 + $0x198] sm:$0xff] }
  0xf6   : > { %5591 = vmatprep.mubr.msk.f32.mxu1 %vm231_vm1, %v6504_v33  ;;  %v6831_v29 = vpop.f32.mrf.mxu0  ;;  %v6851_v33 = vld [vmem:[%s6009_s7 + $0x18a] sm:$0xff] }
  0xf7   : > { %v6833_v30 = vpop.f32.mrf.mxu1 }
  0xf8   : > { %v6838_v31 = vpop.f32.mrf.mxu0  ;;  %5639 = vmatmul.mubr.msk.f32.gmra.mxu0 %vm231_vm1, %v7588_v42 }
  0xf9   : > { %v6842_v34 = vpop.f32.mrf.mxu1  ;;  %5592 = vmatmul.mubr.msk.f32.gmra.mxu1 %vm231_vm1, %v6513_v54  ;;  %5641 = vmatprep.mubr.msk.f32.mxu0 %vm231_vm1, %v6648_v41  ;;  %v4823_v54 = vld [vmem:[%s6009_s7 + $0x1a0] sm:$0xff] }
  0xfa   : > { %5594 = vmatprep.mubr.msk.f32.mxu1 %vm231_vm1, %v6836_v32  ;;  %v6853_v50 = vpop.f32.mrf.mxu0 }
  0xfb   : > { %v6856_v36 = vpop.f32.mrf.mxu1 }
  0xfc   : > { %v6858_v2 = vpop.f32.mrf.mxu0  ;;  %5642 = vmatmul.mubr.msk.f32.gmra.mxu0 %vm231_vm1, %v6659_v44 }
  0xfd   : > { %v6862_v42 = vpop.f32.mrf.mxu1  ;;  %5595 = vmatmul.mubr.msk.f32.gmra.mxu1 %vm231_vm1, %v6851_v33  ;;  %5644 = vmatprep.mubr.msk.f32.mxu0 %vm231_vm1, %v4822_v12 }
  0xfe   : > { %5649 = vmatprep.mubr.msk.f32.mxu1 %vm231_vm1, %v6215_v45  ;;  %v6870_v41 = vpop.f32.mrf.mxu0 }
  0xff   : > { %v6872_v3 = vpop.f32.mrf.mxu1 }
 0x100   : > { %v6874_v9 = vpop.f32.mrf.mxu0  ;;  %5645 = vmatmul.mubr.msk.f32.gmra.mxu0 %vm231_vm1, %v4823_v54  ;;  %v4932_v54 = vld [vmem:[%s6009_s7 + $0x92] sm:$0xff] }
 0x101   : > { %v5351_v44 = vpop.f32.mrf.mxu1  ;;  %5650 = vmatmul.mubr.msk.f32.vlgmr.msra.gmra.mxu1 %vm231_vm1, %v6237_v49  ;;  %5699 = vmatprep.mubr.msk.f32.mxu0 %vm231_vm1, %v7591_v56 }
 0x102   : > { %v980_v4 = vadd.f32 %v5351_v44, %v6755_v5  ;;  %5652 = vmatprep.mubr.msk.f32.mxu1 %vm231_vm1, %v6245_v51  ;;  %v6884_v45 = vpop.f32.mrf.mxu0 }
 0x103   : > { %v788_v21 = vpop.f32.mrf.mxu1 }
 0x104   : > { %v979_v15 = vadd.f32 %v788_v21, %v6767_v10  ;;  %v5401_v43 = vpop.f32.mrf.mxu0  ;;  %5700 = vmatmul.mubr.msk.f32.vlgmr.msra.gmra.mxu0 %vm231_vm1, %v7592_v58 }
 0x105   : > { %v5354_v20 = vpop.f32.mrf.mxu1  ;;  %5653 = vmatmul.mubr.msk.f32.gmra.mxu1 %vm231_vm1, %v6261_v53  ;;  %v6891_v49 = vadd.f32 %v5401_v43, %v980_v4  ;;  %5702 = vmatprep.mubr.msk.f32.mxu0 %vm231_vm1, %v7593_v60 }
 0x106   : > { %v982_v51 = vadd.f32 %v5354_v20, %v6771_v17  ;;  %5655 = vmatprep.mubr.msk.f32.mxu1 %vm231_vm1, %v6267_v55  ;;  %v1242_v56 = vpop.f32.mrf.mxu0 }
 0x107   : > { %v798_v5 = vpop.f32.mrf.mxu1  ;;  %v6898_v10 = vadd.f32 %v1242_v56, %v979_v15  ;;  %v4934_v15 = vld [vmem:[%s6009_s7 + $0xaa] sm:$0xff] }
 0x108   : > { %v981_v58 = vadd.f32 %v798_v5, %v6783_v37  ;;  %v5404_v22 = vpop.f32.mrf.mxu0  ;;  %5703 = vmatmul.mubr.msk.f32.gmra.mxu0 %vm231_vm1, %v7594_v14 }
 0x109   : > { %v5357_v53 = vpop.f32.mrf.mxu1  ;;  %5656 = vmatmul.mubr.msk.f32.gmra.mxu1 %vm231_vm1, %v6281_v57  ;;  %v6905_v60 = vadd.f32 %v5404_v22, %v982_v51  ;;  %5705 = vmatprep.mubr.msk.f32.mxu0 %vm231_vm1, %v7595_v16  ;;  %v4870_v51 = vld [vmem:[%s6009_s7 + $0xc1] sm:$0xff]  ;;  %v4871_v22 = vld [vmem:[%s6009_s7 + $0xc9] sm:$0xff] }
 0x10a   : > { %v984_v55 = vadd.f32 %v5357_v53, %v6787_v40  ;;  %5658 = vmatprep.mubr.msk.f32.mxu1 %vm231_vm1, %v6287_v59  ;;  %v1252_v17 = vpop.f32.mrf.mxu0  ;;  %v4931_v59 = vld [vmem:[%s6009_s7 + $0x82] sm:$0xff] }
 0x10b   : > { %v808_v37 = vpop.f32.mrf.mxu1  ;;  %v6912_v25 = vadd.f32 %v1252_v17, %v981_v58  ;;  %v4936_v53 = vld [vmem:[%s6009_s7 + $0xc2] sm:$0xff] }
 0x10c   : > { %v983_v14 = vadd.f32 %v808_v37, %v6799_v11  ;;  %v5407_v12 = vpop.f32.mrf.mxu0  ;;  %5706 = vmatmul.mubr.msk.f32.gmra.mxu0 %vm231_vm1, %v7596_v46  ;;  %v4872_v37 = vld [vmem:[%s6009_s7 + $0xd9] sm:$0xff] }
 0x10d   : > { %v5360_v57 = vpop.f32.mrf.mxu1  ;;  %5659 = vmatmul.mubr.msk.f32.gmra.mxu1 %vm231_vm1, %v6301_v61  ;;  %v6919_v16 = vadd.f32 %v5407_v12, %v984_v55  ;;  %5708 = vmatprep.mubr.msk.f32.mxu0 %vm231_vm1, %v7597_v19 }
 0x10e   : > { %v986_v40 = vadd.f32 %v5360_v57, %v6803_v35  ;;  %5661 = vmatprep.mubr.msk.f32.mxu1 %vm231_vm1, %v6307_v63  ;;  %v1262_v11 = vpop.f32.mrf.mxu0  ;;  %v4933_v63 = vld [vmem:[%s6009_s7 + $0x9a] sm:$0xff]  ;;  %v4937_v57 = vld [vmem:[%s6009_s7 + $0xca] sm:$0xff] }
 0x10f   : > { %v818_v46 = vpop.f32.mrf.mxu1  ;;  %v6928_v44 = vadd.f32 %v1262_v11, %v983_v14 }
 0x110   : > { %v985_v61 = vadd.f32 %v818_v46, %v6815_v24  ;;  %v5410_v4 = vpop.f32.mrf.mxu0  ;;  %5709 = vmatmul.mubr.msk.f32.gmra.mxu0 %vm231_vm1, %v4931_v59 }
 0x111   : > { %v5363_v21 = vpop.f32.mrf.mxu1  ;;  %5662 = vmatmul.mubr.msk.f32.gmra.mxu1 %vm231_vm1, %v6321_v1  ;;  %v6934_v19 = vadd.f32 %v5410_v4, %v986_v40  ;;  %5711 = vmatprep.mubr.msk.f32.mxu0 %vm231_vm1, %v4932_v54  ;;  %v4873_v40 = vld [vmem:[%s6009_s7 + $0xe1] sm:$0xff] }
 0x112   : > { %v988_v35 = vadd.f32 %v5363_v21, %v6819_v28  ;;  %5664 = vmatprep.mubr.msk.f32.mxu1 %vm231_vm1, %v6327_v6  ;;  %v1272_v24 = vpop.f32.mrf.mxu0  ;;  %v4935_v6 = vld [vmem:[%s6009_s7 + $0xb2] sm:$0xff] }
 0x113   : > { %v828_v43 = vpop.f32.mrf.mxu1  ;;  %v6942_v20 = vadd.f32 %v1272_v24, %v985_v61  ;;  %v4874_v61 = vld [vmem:[%s6009_s7 + $0xf1] sm:$0xff] }
 0x114   : > { %v987_v1 = vadd.f32 %v828_v43, %v6831_v29  ;;  %v5413_v56 = vpop.f32.mrf.mxu0  ;;  %5712 = vmatmul.mubr.msk.f32.gmra.mxu0 %vm231_vm1, %v4933_v63 }
 0x115   : > { %v5366_v5 = vpop.f32.mrf.mxu1  ;;  %5665 = vmatmul.mubr.msk.f32.gmra.mxu1 %vm231_vm1, %v6341_v8  ;;  %v6949_v28 = vadd.f32 %v5413_v56, %v988_v35  ;;  %5714 = vmatprep.mubr.msk.f32.mxu0 %vm231_vm1, %v4934_v15  ;;  %v4939_v35 = vld [vmem:[%s6009_s7 + $0xe2] sm:$0xff]  ;;  %v4875_v15 = vld [vmem:[%s6009_s7 + $0xf9] sm:$0xff] }
 0x116   : > { %v990_v58 = vadd.f32 %v5366_v5, %v6838_v31  ;;  %5667 = vmatprep.mubr.msk.f32.mxu1 %vm231_vm1, %v4870_v51  ;;  %v1282_v29 = vpop.f32.mrf.mxu0  ;;  %v4876_v56 = vld [vmem:[%s6009_s7 + $0x109] sm:$0xff] }
 0x117   : > { %v838_v55 = vpop.f32.mrf.mxu1  ;;  %v6957_v17 = vadd.f32 %v1282_v29, %v987_v1 }
 0x118   : > { %v989_v8 = vadd.f32 %v838_v55, %v6853_v50  ;;  %v5416_v14 = vpop.f32.mrf.mxu0  ;;  %5715 = vmatmul.mubr.msk.f32.gmra.mxu0 %vm231_vm1, %v4935_v6  ;;  %v4938_v50 = vld [vmem:[%s6009_s7 + $0xda] sm:$0xff] }
 0x119   : > { %v5369_v12 = vpop.f32.mrf.mxu1  ;;  %5668 = vmatmul.mubr.msk.f32.gmra.mxu1 %vm231_vm1, %v4871_v22  ;;  %v6963_v31 = vadd.f32 %v5416_v14, %v990_v58  ;;  %5717 = vmatprep.mubr.msk.f32.mxu0 %vm231_vm1, %v4936_v53  ;;  %v4941_v22 = vld [vmem:[%s6009_s7 + $0xfa] sm:$0xff]  ;;  %v4877_v53 = vld [vmem:[%s6009_s7 + $0x111] sm:$0xff] }
 0x11a   : > { %v992_v59 = vadd.f32 %v5369_v12, %v6858_v2  ;;  %5670 = vmatprep.mubr.msk.f32.mxu1 %vm231_vm1, %v4872_v37  ;;  %v1292_v11 = vpop.f32.mrf.mxu0  ;;  %v4878_v14 = vld [vmem:[%s6009_s7 + $0x121] sm:$0xff] }
 0x11b   : > { %v848_v54 = vpop.f32.mrf.mxu1  ;;  %v6971_v46 = vadd.f32 %v1292_v11, %v989_v8 }
 0x11c   : > { %v991_v4 = vadd.f32 %v848_v54, %v6870_v41  ;;  %v5419_v21 = vpop.f32.mrf.mxu0  ;;  %5718 = vmatmul.mubr.msk.f32.gmra.mxu0 %vm231_vm1, %v4937_v57  ;;  %v4940_v41 = vld [vmem:[%s6009_s7 + $0xf2] sm:$0xff] }
 0x11d   : > { %v5372_v63 = vpop.f32.mrf.mxu1  ;;  %5671 = vmatmul.mubr.msk.f32.gmra.mxu1 %vm231_vm1, %v4873_v40  ;;  %v6977_v2 = vadd.f32 %v5419_v21, %v992_v59  ;;  %5720 = vmatprep.mubr.msk.f32.mxu0 %vm231_vm1, %v4938_v50  ;;  %v4943_v40 = vld [vmem:[%s6009_s7 + $0x112] sm:$0xff]  ;;  %v4879_v50 = vld [vmem:[%s6009_s7 + $0x129] sm:$0xff] }
 0x11e   : > { %v994_v24 = vadd.f32 %v5372_v63, %v6874_v9  ;;  %5673 = vmatprep.mubr.msk.f32.mxu1 %vm231_vm1, %v4874_v61  ;;  %v1302_v43 = vpop.f32.mrf.mxu0  ;;  %v4880_v21 = vld [vmem:[%s6009_s7 + $0x139] sm:$0xff] }
 0x11f   : > { %v858_v51 = vpop.f32.mrf.mxu1  ;;  %v6985_v1 = vadd.f32 %v1302_v43, %v991_v4 }
 0x120   : > { %v993_v5 = vadd.f32 %v858_v51, %v6884_v45  ;;  %v5422_v6 = vpop.f32.mrf.mxu0  ;;  %5721 = vmatmul.mubr.msk.f32.gmra.mxu0 %vm231_vm1, %v4939_v35  ;;  %v4942_v45 = vld [vmem:[%s6009_s7 + $0x10a] sm:$0xff] }
 0x121   : > { %v5375_v58 = vpop.f32.mrf.mxu1  ;;  %5674 = vmatmul.mubr.msk.f32.gmra.mxu1 %vm231_vm1, %v4875_v15  ;;  %v6991_v9 = vadd.f32 %v5422_v6, %v994_v24  ;;  %5723 = vmatprep.mubr.msk.f32.mxu0 %vm231_vm1, %v4940_v41  ;;  %v4945_v15 = vld [vmem:[%s6009_s7 + $0x12a] sm:$0xff]  ;;  %v4881_v41 = vld [vmem:[%s6009_s7 + $0x141] sm:$0xff] }
 0x122   : > { %v996_v29 = vadd.f32 %v5375_v58, %v6745_v38  ;;  %5676 = vmatprep.mubr.msk.f32.mxu1 %vm231_vm1, %v4876_v56  ;;  %v1312_v55 = vpop.f32.mrf.mxu0  ;;  %v4882_v6 = vld [vmem:[%s6009_s7 + $0x151] sm:$0xff] }
 0x123   : > { %v868_v37 = vpop.f32.mrf.mxu1  ;;  %v6999_v8 = vadd.f32 %v1312_v55, %v993_v5 }
 0x124   : > { %v995_v12 = vadd.f32 %v868_v37, %v6753_v62  ;;  %v5425_v57 = vpop.f32.mrf.mxu0  ;;  %5724 = vmatmul.mubr.msk.f32.gmra.mxu0 %vm231_vm1, %v4941_v22  ;;  %v4944_v62 = vld [vmem:[%s6009_s7 + $0x122] sm:$0xff] }
 0x125   : > { %v5378_v59 = vpop.f32.mrf.mxu1  ;;  %5677 = vmatmul.mubr.msk.f32.gmra.mxu1 %vm231_vm1, %v4877_v53  ;;  %v7005_v38 = vadd.f32 %v5425_v57, %v996_v29  ;;  %5726 = vmatprep.mubr.msk.f32.mxu0 %vm231_vm1, %v4942_v45  ;;  %v4947_v53 = vld [vmem:[%s6009_s7 + $0x142] sm:$0xff]  ;;  %v4883_v45 = vld [vmem:[%s6009_s7 + $0x159] sm:$0xff] }
 0x126   : > { %v998_v11 = vadd.f32 %v5378_v59, %v6759_v0  ;;  %5679 = vmatprep.mubr.msk.f32.mxu1 %vm231_vm1, %v4878_v14  ;;  %v1322_v54 = vpop.f32.mrf.mxu0  ;;  %v4884_v57 = vld [vmem:[%s6009_s7 + $0x169] sm:$0xff] }
 0x127   : > { %v878_v61 = vpop.f32.mrf.mxu1  ;;  %v7013_v4 = vadd.f32 %v1322_v54, %v995_v12 }
 0x128   : > { %v997_v63 = vadd.f32 %v878_v61, %v6769_v7  ;;  %v5428_v35 = vpop.f32.mrf.mxu0  ;;  %5727 = vmatmul.mubr.msk.f32.gmra.mxu0 %vm231_vm1, %v4943_v40  ;;  %v4946_v7 = vld [vmem:[%s6009_s7 + $0x13a] sm:$0xff] }
 0x129   : > { %v5381_v24 = vpop.f32.mrf.mxu1  ;;  %5680 = vmatmul.mubr.msk.f32.gmra.mxu1 %vm231_vm1, %v4879_v50  ;;  %v7019_v0 = vadd.f32 %v5428_v35, %v998_v11  ;;  %5729 = vmatprep.mubr.msk.f32.mxu0 %vm231_vm1, %v4944_v62  ;;  %v4949_v50 = vld [vmem:[%s6009_s7 + $0x15a] sm:$0xff]  ;;  %v4885_v62 = vld [vmem:[%s6009_s7 + $0x171] sm:$0xff] }
 0x12a   : > { %v1000_v43 = vadd.f32 %v5381_v24, %v6775_v13  ;;  %5682 = vmatprep.mubr.msk.f32.mxu1 %vm231_vm1, %v4880_v21  ;;  %v1332_v51 = vpop.f32.mrf.mxu0  ;;  %v4950_v21 = vld [vmem:[%s6009_s7 + $0x16a] sm:$0xff] }
 0x12b   : > { %v888_v56 = vpop.f32.mrf.mxu1  ;;  %v7027_v5 = vadd.f32 %v1332_v51, %v997_v63 }
 0x12c   : > { %v999_v58 = vadd.f32 %v888_v56, %v6785_v39  ;;  %v5431_v22 = vpop.f32.mrf.mxu0  ;;  %5730 = vmatmul.mubr.msk.f32.gmra.mxu0 %vm231_vm1, %v4945_v15  ;;  %v4948_v39 = vld [vmem:[%s6009_s7 + $0x152] sm:$0xff] }
 0x12d   : > { %v5384_v29 = vpop.f32.mrf.mxu1  ;;  %5683 = vmatmul.mubr.msk.f32.gmra.mxu1 %vm231_vm1, %v4881_v41  ;;  %v7033_v13 = vadd.f32 %v5431_v22, %v1000_v43  ;;  %5732 = vmatprep.mubr.msk.f32.mxu0 %vm231_vm1, %v4946_v7  ;;  %v4888_v56 = vld [vmem:[%s6009_s7 + $0x199] sm:$0xff] }
 0x12e   : > { %v1002_v55 = vadd.f32 %v5384_v29, %v6791_v18  ;;  %5685 = vmatprep.mubr.msk.f32.mxu1 %vm231_vm1, %v4882_v6  ;;  %v1342_v37 = vpop.f32.mrf.mxu0 }
 0x12f   : > { %v898_v14 = vpop.f32.mrf.mxu1  ;;  %v7041_v12 = vadd.f32 %v1342_v37, %v999_v58 }
 0x130   : > { %v1001_v59 = vadd.f32 %v898_v14, %v6801_v52  ;;  %v5434_v40 = vpop.f32.mrf.mxu0  ;;  %5733 = vmatmul.mubr.msk.f32.gmra.mxu0 %vm231_vm1, %v4947_v53 }
 0x131   : > { %v5387_v11 = vpop.f32.mrf.mxu1  ;;  %5686 = vmatmul.mubr.msk.f32.gmra.mxu1 %vm231_vm1, %v4883_v45  ;;  %v7047_v18 = vadd.f32 %v5434_v40, %v1002_v55  ;;  %5735 = vmatprep.mubr.msk.f32.mxu0 %vm231_vm1, %v4948_v39 }
 0x132   : > { %v1004_v54 = vadd.f32 %v5387_v11, %v6807_v23  ;;  %5688 = vmatprep.mubr.msk.f32.mxu1 %vm231_vm1, %v4884_v57  ;;  %v1352_v61 = vpop.f32.mrf.mxu0  ;;  %v4951_v23 = vld [vmem:[%s6009_s7 + $0x172] sm:$0xff] }
 0x133   : > { %v908_v52 = vpop.f32.mrf.mxu1  ;;  %v7055_v63 = vadd.f32 %v1352_v61, %v1001_v59 }
 0x134   : > { %v1003_v35 = vadd.f32 %v908_v52, %v6817_v26  ;;  %v5437_v24 = vpop.f32.mrf.mxu0  ;;  %5736 = vmatmul.mubr.msk.f32.gmra.mxu0 %vm231_vm1, %v4949_v50 }
 0x135   : > { %v5390_v15 = vpop.f32.mrf.mxu1  ;;  %5689 = vmatmul.mubr.msk.f32.gmra.mxu1 %vm231_vm1, %v4885_v62  ;;  %v7060_v43 = vadd.f32 %v5437_v24, %v1004_v54  ;;  %5738 = vmatprep.mubr.msk.f32.mxu0 %vm231_vm1, %v4950_v21 }
 0x136   : > { %v1006_v41 = vadd.f32 %v5390_v15, %v6823_v27  ;;  %5691 = vmatprep.mubr.msk.f32.mxu1 %vm231_vm1, %v6662_v47  ;;  %v1362_v51 = vpop.f32.mrf.mxu0  ;;  %v4889_v27 = vld [vmem:[%s6009_s7 + $0x1a1] sm:$0xff] }
 0x137   : > { %v918_v26 = vpop.f32.mrf.mxu1  ;;  %v7067_v7 = vadd.f32 %v1362_v51, %v1003_v35 }
 0x138   : > { %v1005_v6 = vadd.f32 %v918_v26, %v6833_v30  ;;  %v5440_v58 = vpop.f32.mrf.mxu0  ;;  %5739 = vmatmul.mubr.msk.f32.gmra.mxu0 %vm231_vm1, %v4951_v23  ;;  %v4954_v30 = vld [vmem:[%s6009_s7 + $0x19a] sm:$0xff] }
 0x139   : > { %v5393_v22 = vpop.f32.mrf.mxu1  ;;  %5692 = vmatmul.mubr.msk.f32.gmra.mxu1 %vm231_vm1, %v6671_v48  ;;  %v7074_v29 = vadd.f32 %v5440_v58, %v1006_v41  ;;  %5741 = vmatprep.mubr.msk.f32.mxu0 %vm231_vm1, %v6836_v32 }
 0x13a   : > { %v1008_v47 = vadd.f32 %v5393_v22, %v6842_v34  ;;  %5694 = vmatprep.mubr.msk.f32.mxu1 %vm231_vm1, %v4888_v56  ;;  %v1372_v53 = vpop.f32.mrf.mxu0  ;;  %v4955_v34 = vld [vmem:[%s6009_s7 + $0x1a2] sm:$0xff]  ;;  %s4999_s7 = sshll.u32 %s5972_s19, 12 }
 0x13b   : > { %v928_v55 = vpop.f32.mrf.mxu1  ;;  %v7082_v45 = vadd.f32 %v1372_v53, %v1005_v6  ;;  %s7447_s22 = scalar_lea.hbm %s7515_s2, %s4999_s7 }
 0x13c   : > { %v1007_v37 = vadd.f32 %v928_v55, %v6856_v36  ;;  %v5443_v39 = vpop.f32.mrf.mxu0  ;;  %5742 = vmatmul.mubr.msk.f32.gmra.mxu0 %vm231_vm1, %v6851_v33 }
 0x13d   : > { %v5396_v48 = vpop.f32.mrf.mxu1  ;;  %5695 = vmatmul.mubr.msk.f32.gmra.mxu1 %vm231_vm1, %v4889_v27  ;;  %v7088_v32 = vadd.f32 %v5443_v39, %v1008_v47  ;;  %5744 = vmatprep.mubr.msk.f32.mxu0 %vm231_vm1, %v4954_v30 }
 0x13e   : > { %v1010_v14 = vadd.f32 %v5396_v48, %v6862_v42  ;;  %v1382_v57 = vpop.f32.mrf.mxu0 }
 0x13f   : > { %v938_v59 = vpop.f32.mrf.mxu1  ;;  %v7093_v40 = vadd.f32 %v1382_v57, %v1007_v37 }
 0x140   : > { %v1009_v36 = vadd.f32 %v938_v59, %v6872_v3  ;;  %v5446_v11 = vpop.f32.mrf.mxu0  ;;  %5745 = vmatmul.mubr.msk.f32.gmra.mxu0 %vm231_vm1, %v4955_v34 }
 0x141   : > { %v5451_v33 = vpop.f32.mrf.mxu1  ;;  %v7097_v50 = vadd.f32 %v5446_v11, %v1010_v14 }
 0x142   : > { %v1889_v54 = vadd.f32 %v5451_v33, %v6891_v49  ;;  %v1392_v62 = vpop.f32.mrf.mxu0 }
 0x143   : > { %v1697_v61 = vpop.f32.mrf.mxu1  ;;  %v7100_v21 = vadd.f32 %v1392_v62, %v1009_v36 }
 0x144   : > { %v1888_v42 = vadd.f32 %v1697_v61, %v6898_v10  ;;  %v5501_v52 = vpop.f32.mrf.mxu0 }
 0x145   : > { %v5454_v35 = vpop.f32.mrf.mxu1  ;;  %v7103_v24 = vadd.f32 %v5501_v52, %v1889_v54 }
 0x146   : > { %v1891_v3 = vadd.f32 %v5454_v35, %v6905_v60  ;;  %v2151_v15 = vpop.f32.mrf.mxu0 }
 0x147   : > { %v1707_v23 = vpop.f32.mrf.mxu1  ;;  %v7106_v41 = vadd.f32 %v2151_v15, %v1888_v42 }
 0x148   : > { %v1890_v51 = vadd.f32 %v1707_v23, %v6912_v25  ;;  %v5504_v26 = vpop.f32.mrf.mxu0 }
 0x149   : > { %v5457_v49 = vpop.f32.mrf.mxu1  ;;  %v7109_v56 = vadd.f32 %v5504_v26, %v1891_v3 }
 0x14a   : > { %v1893_v6 = vadd.f32 %v5457_v49, %v6919_v16  ;;  %v2161_v58 = vpop.f32.mrf.mxu0 }
 0x14b   : > { %v1717_v10 = vpop.f32.mrf.mxu1  ;;  %v7112_v22 = vadd.f32 %v2161_v58, %v1890_v51 }
 0x14c   : > { %v1892_v47 = vadd.f32 %v1717_v10, %v6928_v44  ;;  %v5507_v27 = vpop.f32.mrf.mxu0 }
 0x14d   : > { %v5460_v60 = vpop.f32.mrf.mxu1  ;;  %v7115_v53 = vadd.f32 %v5507_v27, %v1893_v6 }
 0x14e   : > { %v1895_v30 = vadd.f32 %v5460_v60, %v6934_v19  ;;  %v2171_v55 = vpop.f32.mrf.mxu0 }
 0x14f   : > { %v1727_v25 = vpop.f32.mrf.mxu1  ;;  %v7118_v37 = vadd.f32 %v2171_v55, %v1892_v47 }
 0x150   : > { %v1894_v39 = vadd.f32 %v1727_v25, %v6942_v20  ;;  %v5510_v48 = vpop.f32.mrf.mxu0 }
 0x151   : > { %v5463_v16 = vpop.f32.mrf.mxu1  ;;  %v7121_v34 = vadd.f32 %v5510_v48, %v1895_v30 }
 0x152   : > { %v1897_v14 = vadd.f32 %v5463_v16, %v6949_v28  ;;  %v2181_v57 = vpop.f32.mrf.mxu0 }
 0x153   : > { %v1737_v44 = vpop.f32.mrf.mxu1  ;;  %v7124_v59 = vadd.f32 %v2181_v57, %v1894_v39 }
 0x154   : > { %v1896_v36 = vadd.f32 %v1737_v44, %v6957_v17  ;;  %v5513_v11 = vpop.f32.mrf.mxu0 }
 0x155   : > { %v5466_v19 = vpop.f32.mrf.mxu1  ;;  %v7127_v33 = vadd.f32 %v5513_v11, %v1897_v14 }
 0x156   : > { %v1899_v54 = vadd.f32 %v5466_v19, %v6963_v31  ;;  %v2191_v62 = vpop.f32.mrf.mxu0 }
 0x157   : > { %v1747_v20 = vpop.f32.mrf.mxu1  ;;  %v7130_v61 = vadd.f32 %v2191_v62, %v1896_v36 }
 0x158   : > { %v1898_v42 = vadd.f32 %v1747_v20, %v6971_v46  ;;  %v5516_v52 = vpop.f32.mrf.mxu0 }
 0x159   : > { %v5469_v28 = vpop.f32.mrf.mxu1  ;;  %v7133_v35 = vadd.f32 %v5516_v52, %v1899_v54 }
 0x15a   : > { %v1901_v3 = vadd.f32 %v5469_v28, %v6977_v2  ;;  %v2201_v15 = vpop.f32.mrf.mxu0 }
 0x15b   : > { %v1757_v17 = vpop.f32.mrf.mxu1  ;;  %v7136_v23 = vadd.f32 %v2201_v15, %v1898_v42 }
 0x15c   : > { %v1900_v51 = vadd.f32 %v1757_v17, %v6985_v1  ;;  %v5519_v26 = vpop.f32.mrf.mxu0 }
 0x15d   : > { %v5472_v31 = vpop.f32.mrf.mxu1  ;;  %v7139_v49 = vadd.f32 %v5519_v26, %v1901_v3 }
 0x15e   : > { %v1903_v6 = vadd.f32 %v5472_v31, %v6991_v9  ;;  %v2211_v58 = vpop.f32.mrf.mxu0 }
 0x15f   : > { %v1767_v46 = vpop.f32.mrf.mxu1  ;;  %v7142_v10 = vadd.f32 %v2211_v58, %v1900_v51 }
 0x160   : > { %v1902_v47 = vadd.f32 %v1767_v46, %v6999_v8  ;;  %v5522_v27 = vpop.f32.mrf.mxu0 }
 0x161   : > { %v5475_v2 = vpop.f32.mrf.mxu1  ;;  %v7145_v60 = vadd.f32 %v5522_v27, %v1903_v6 }
 0x162   : > { %v1905_v30 = vadd.f32 %v5475_v2, %v7005_v38  ;;  %v2221_v55 = vpop.f32.mrf.mxu0 }
 0x163   : > { %v1777_v1 = vpop.f32.mrf.mxu1  ;;  %v7148_v25 = vadd.f32 %v2221_v55, %v1902_v47 }
 0x164   : > { %v1904_v39 = vadd.f32 %v1777_v1, %v7013_v4  ;;  %v5525_v48 = vpop.f32.mrf.mxu0 }
 0x165   : > { %v5478_v9 = vpop.f32.mrf.mxu1  ;;  %v7151_v16 = vadd.f32 %v5525_v48, %v1905_v30 }
 0x166   : > { %v1907_v14 = vadd.f32 %v5478_v9, %v7019_v0  ;;  %v2231_v57 = vpop.f32.mrf.mxu0 }
 0x167   : > { %v1787_v8 = vpop.f32.mrf.mxu1  ;;  %v7154_v44 = vadd.f32 %v2231_v57, %v1904_v39 }
 0x168   : > { %v1906_v36 = vadd.f32 %v1787_v8, %v7027_v5  ;;  %v5528_v11 = vpop.f32.mrf.mxu0 }
 0x169   : > { %v5481_v38 = vpop.f32.mrf.mxu1  ;;  %v7157_v19 = vadd.f32 %v5528_v11, %v1907_v14 }
 0x16a   : > { %v1909_v54 = vadd.f32 %v5481_v38, %v7033_v13  ;;  %v2241_v62 = vpop.f32.mrf.mxu0 }
 0x16b   : > { %v1797_v4 = vpop.f32.mrf.mxu1  ;;  %v7160_v20 = vadd.f32 %v2241_v62, %v1906_v36 }
 0x16c   : > { %v1908_v42 = vadd.f32 %v1797_v4, %v7041_v12  ;;  %v5531_v52 = vpop.f32.mrf.mxu0 }
 0x16d   : > { %7616 = vst [vmem:[#allocation9_spill] sm:$0xff] %v7160_v20  ;;  %v5484_v0 = vpop.f32.mrf.mxu1  ;;  %v7163_v28 = vadd.f32 %v5531_v52, %v1909_v54 }
 0x16e   : > { %v1911_v3 = vadd.f32 %v5484_v0, %v7047_v18  ;;  %v2251_v15 = vpop.f32.mrf.mxu0 }
 0x16f   : > { %7617 = vst [vmem:[#allocation10_spill] sm:$0xff] %v7163_v28  ;;  %v1807_v5 = vpop.f32.mrf.mxu1  ;;  %v7166_v17 = vadd.f32 %v2251_v15, %v1908_v42 }
 0x170   : > { %v1910_v51 = vadd.f32 %v1807_v5, %v7055_v63  ;;  %v5534_v26 = vpop.f32.mrf.mxu0 }
 0x171   : > { %7618 = vst [vmem:[#allocation11_spill] sm:$0xff] %v7166_v17  ;;  %v5487_v13 = vpop.f32.mrf.mxu1  ;;  %v7169_v31 = vadd.f32 %v5534_v26, %v1911_v3 }
 0x172   : > { %v1913_v6 = vadd.f32 %v5487_v13, %v7060_v43  ;;  %v2261_v58 = vpop.f32.mrf.mxu0 }
 0x173   : > { %7619 = vst [vmem:[#allocation12_spill] sm:$0xff] %v7169_v31  ;;  %v1817_v12 = vpop.f32.mrf.mxu1  ;;  %v7172_v46 = vadd.f32 %v2261_v58, %v1910_v51 }
 0x174   : > { %v1912_v47 = vadd.f32 %v1817_v12, %v7067_v7  ;;  %v5537_v27 = vpop.f32.mrf.mxu0 }
 0x175   : > { %7620 = vst [vmem:[#allocation13_spill] sm:$0xff] %v7172_v46  ;;  %v5490_v18 = vpop.f32.mrf.mxu1  ;;  %v7175_v2 = vadd.f32 %v5537_v27, %v1913_v6 }
 0x176   : > { %v1915_v30 = vadd.f32 %v5490_v18, %v7074_v29  ;;  %v2271_v55 = vpop.f32.mrf.mxu0 }
 0x177   : > { %7621 = vst [vmem:[#allocation14_spill] sm:$0xff] %v7175_v2  ;;  %v1827_v63 = vpop.f32.mrf.mxu1  ;;  %v7178_v1 = vadd.f32 %v2271_v55, %v1912_v47 }
 0x178   : > { %v1914_v39 = vadd.f32 %v1827_v63, %v7082_v45  ;;  %v5540_v48 = vpop.f32.mrf.mxu0 }
 0x179   : > { %7622 = vst [vmem:[#allocation15_spill] sm:$0xff] %v7178_v1  ;;  %v5493_v43 = vpop.f32.mrf.mxu1  ;;  %v7181_v9 = vadd.f32 %v5540_v48, %v1915_v30 }
 0x17a   : > { %v1917_v14 = vadd.f32 %v5493_v43, %v7088_v32  ;;  %v2281_v57 = vpop.f32.mrf.mxu0 }
 0x17b   : > { %7623 = vst [vmem:[#allocation16_spill] sm:$0xff] %v7181_v9  ;;  %v1837_v7 = vpop.f32.mrf.mxu1  ;;  %v7184_v8 = vadd.f32 %v2281_v57, %v1914_v39 }
 0x17c   : > { %v1916_v36 = vadd.f32 %v1837_v7, %v7093_v40  ;;  %v5543_v11 = vpop.f32.mrf.mxu0 }
 0x17d   : > { %7624 = vst [vmem:[#allocation17_spill] sm:$0xff] %v7184_v8  ;;  %v5496_v29 = vpop.f32.mrf.mxu1  ;;  %v7187_v38 = vadd.f32 %v5543_v11, %v1917_v14 }
 0x17e   : > { %v1919_v54 = vadd.f32 %v5496_v29, %v7097_v50  ;;  %v2291_v62 = vpop.f32.mrf.mxu0 }
 0x17f   : > { %7625 = vst [vmem:[#allocation18_spill] sm:$0xff] %v7187_v38  ;;  %v1847_v45 = vpop.f32.mrf.mxu1  ;;  %v7190_v4 = vadd.f32 %v2291_v62, %v1916_v36 }
 0x180   : > { %v1918_v42 = vadd.f32 %v1847_v45, %v7100_v21  ;;  %v5546_v52 = vpop.f32.mrf.mxu0 }
 0x181   : > { %7626 = vst [vmem:[#allocation19_spill] sm:$0xff] %v7190_v4  ;;  %v5551_v32 = vpop.f32.mrf.mxu1  ;;  %v7193_v0 = vadd.f32 %v5546_v52, %v1919_v54 }
 0x182   : > { %v2301_v3 = vpop.f32.mrf.mxu0 }
 0x183   : > { %7627 = vst [vmem:[#allocation20_spill] sm:$0xff] %v7193_v0  ;;  %v2605_v15 = vpop.f32.mrf.mxu1  ;;  %v7195_v5 = vadd.f32 %v2301_v3, %v1918_v42 }
 0x184   : > { %v7197_v40 = vpop.f32.mrf.mxu0 }
 0x185   : > { %7628 = vst [vmem:[#allocation21_spill] sm:$0xff] %v7195_v5  ;;  %v5554_v51 = vpop.f32.mrf.mxu1 }
 0x186   : > { %v7199_v26 = vpop.f32.mrf.mxu0 }
 0x187   : > { %v7201_v50 = vpop.f32.mrf.mxu1 }
 0x188   : > { %v7203_v13 = vpop.f32.mrf.mxu0 }
 0x189   : > { %v7205_v6 = vpop.f32.mrf.mxu1 }
 0x18a   : > { %v7207_v21 = vpop.f32.mrf.mxu0 }
 0x18b   : > { %v7209_v58 = vpop.f32.mrf.mxu1 }
 0x18c   : > { %v7211_v12 = vpop.f32.mrf.mxu0 }
 0x18d   : > { %v7213_v47 = vpop.f32.mrf.mxu1 }
 0x18e   : > { %v7215_v27 = vpop.f32.mrf.mxu0 }
 0x18f   : > { %v7217_v18 = vpop.f32.mrf.mxu1 }
 0x190   : > { %v7219_v30 = vpop.f32.mrf.mxu0 }
 0x191   : > { %v7221_v55 = vpop.f32.mrf.mxu1 }
 0x192   : > { %v7223_v63 = vpop.f32.mrf.mxu0 }
 0x193   : > { %v7225_v39 = vpop.f32.mrf.mxu1 }
 0x194   : > { %v7227_v48 = vpop.f32.mrf.mxu0 }
 0x195   : > { %v7229_v43 = vpop.f32.mrf.mxu1 }
 0x196   : > { %v7231_v14 = vpop.f32.mrf.mxu0 }
 0x197   : > { %v7233_v57 = vpop.f32.mrf.mxu1 }
 0x198   : > { %v7235_v7 = vpop.f32.mrf.mxu0 }
 0x199   : > { %v7237_v36 = vpop.f32.mrf.mxu1 }
 0x19a   : > { %v7239_v11 = vpop.f32.mrf.mxu0 }
 0x19b   : > { %v7241_v29 = vpop.f32.mrf.mxu1 }
 0x19c   : > { %v7243_v54 = vpop.f32.mrf.mxu0 }
 0x19d   : > { %v7245_v62 = vpop.f32.mrf.mxu1 }
 0x19e   : > { %v7247_v45 = vpop.f32.mrf.mxu0 }
 0x19f   : > { %v7249_v42 = vpop.f32.mrf.mxu1 }
 0x1a0   : > { %v7251_v52 = vpop.f32.mrf.mxu0 }
 0x1a1   : > { %v7253_v3 = vpop.f32.mrf.mxu1 }
 0x1a2   : > { %v7255_v5 = vpop.f32.mrf.mxu0 }
 0x1a3   : > { %v7257_v0 = vpop.f32.mrf.mxu1 }
 0x1a4   : > { %v7259_v4 = vpop.f32.mrf.mxu0 }
 0x1a5   : > { %7629 = vst [vmem:[#allocation22_spill] sm:$0xff] %v7259_v4  ;;  %v7261_v38 = vpop.f32.mrf.mxu1 }
 0x1a6   : > { %7630 = vst [vmem:[#allocation23_spill] sm:$0xff] %v7261_v38  ;;  %v7263_v8 = vpop.f32.mrf.mxu0 }
 0x1a7   : > { %7631 = vst [vmem:[#allocation24_spill] sm:$0xff] %v7263_v8  ;;  %v7265_v9 = vpop.f32.mrf.mxu1 }
 0x1a8   : > { %7632 = vst [vmem:[#allocation25_spill] sm:$0xff] %v7265_v9  ;;  %v7267_v1 = vpop.f32.mrf.mxu0 }
 0x1a9   : > { %7633 = vst [vmem:[#allocation26_spill] sm:$0xff] %v7267_v1  ;;  %v7269_v2 = vpop.f32.mrf.mxu1 }
 0x1aa   : > { %7634 = vst [vmem:[#allocation27_spill] sm:$0xff] %v7269_v2  ;;  %v7271_v46 = vpop.f32.mrf.mxu0 }
 0x1ab   : > { %7635 = vst [vmem:[#allocation28_spill] sm:$0xff] %v7271_v46  ;;  %v7273_v31 = vpop.f32.mrf.mxu1 }
 0x1ac   : > { %7636 = vst [vmem:[#allocation29_spill] sm:$0xff] %v7273_v31  ;;  %v7275_v17 = vpop.f32.mrf.mxu0 }
 0x1ad   : > { %7637 = vst [vmem:[#allocation30_spill] sm:$0xff] %v7275_v17  ;;  %v7277_v28 = vpop.f32.mrf.mxu1 }
 0x1ae   : > { %7638 = vst [vmem:[#allocation31_spill] sm:$0xff] %v7277_v28  ;;  %v7279_v20 = vpop.f32.mrf.mxu0 }
 0x1af   : > { %7639 = vst [vmem:[#allocation32_spill] sm:$0xff] %v7279_v20  ;;  %v7281_v4 = vpop.f32.mrf.mxu1 }
 0x1b0   : > { %7640 = vst [vmem:[#allocation33_spill] sm:$0xff] %v7281_v4  ;;  %v7283_v38 = vpop.f32.mrf.mxu0 }
 0x1b1   : > { %7641 = vst [vmem:[#allocation34_spill] sm:$0xff] %v7283_v38  ;;  %v7285_v8 = vpop.f32.mrf.mxu1 }
 0x1b2   : > { %7642 = vst [vmem:[#allocation35_spill] sm:$0xff] %v7285_v8  ;;  %v7287_v9 = vpop.f32.mrf.mxu0 }
 0x1b3   : > { %7643 = vst [vmem:[#allocation36_spill] sm:$0xff] %v7287_v9  ;;  %v7289_v1 = vpop.f32.mrf.mxu1  ;;  %v2797_v9 = vadd.f32 %v5551_v32, %v7103_v24  ;;  %v2798_v24 = vadd.f32 %v7201_v50, %v7112_v22  ;;  %v2800_v22 = vadd.f32 %v7209_v58, %v7118_v37  ;;  %v2802_v58 = vadd.f32 %v7217_v18, %v7124_v59 }
 0x1b4   : > { %7644 = vst [vmem:[#allocation37_spill] sm:$0xff] %v7289_v1  ;;  %v7291_v2 = vpop.f32.mrf.mxu0 }
 0x1b5   : > { %7645 = vst [vmem:[#allocation38_spill] sm:$0xff] %v7291_v2  ;;  %v7293_v46 = vpop.f32.mrf.mxu1  ;;  %v2796_v2 = vadd.f32 %v2605_v15, %v7106_v41  ;;  %v2801_v15 = vadd.f32 %v7205_v6, %v7115_v53  ;;  %v3253_v50 = vadd.f32 %v7207_v21, %v2798_v24  ;;  %v2803_v53 = vadd.f32 %v7213_v47, %v7121_v34 }
 0x1b6   : > { %7646 = vst [vmem:[#allocation39_spill] sm:$0xff] %v7293_v46  ;;  %v7295_v31 = vpop.f32.mrf.mxu0  ;;  %v3255_v24 = vadd.f32 %v7215_v27, %v2800_v22  ;;  %v2804_v27 = vadd.f32 %v7225_v39, %v7130_v61  ;;  %v3257_v22 = vadd.f32 %v7223_v63, %v2802_v58 }
 0x1b7   : > { %7647 = vst [vmem:[#allocation40_spill] sm:$0xff] %v7295_v31  ;;  %v7297_v17 = vpop.f32.mrf.mxu1  ;;  %v3251_v32 = vadd.f32 %v7199_v26, %v2796_v2 }
 0x1b8   : > { %7648 = vst [vmem:[#allocation41_spill] sm:$0xff] %v7297_v17  ;;  %v7299_v28 = vpop.f32.mrf.mxu0 }
 0x1b9   : > { %7649 = vst [vmem:[#allocation42_spill] sm:$0xff] %v7299_v28  ;;  %v7301_v20 = vpop.f32.mrf.mxu1  ;;  %v2799_v28 = vadd.f32 %v5554_v51, %v7109_v56 }
 0x1ba   : > { %7650 = vst [vmem:[#allocation43_spill] sm:$0xff] %v7301_v20  ;;  %v7303_v4 = vpop.f32.mrf.mxu0  ;;  %v3252_v20 = vadd.f32 %v7197_v40, %v2797_v9 }
 0x1bb   : > { %7651 = vst [vmem:[#allocation44_spill] sm:$0xff] %v7303_v4  ;;  %v7305_v38 = vpop.f32.mrf.mxu1  ;;  %v3254_v56 = vadd.f32 %v7203_v13, %v2799_v28  ;;  %v3256_v28 = vadd.f32 %v7211_v12, %v2801_v15  ;;  %v2805_v15 = vadd.f32 %v7221_v55, %v7127_v33 }
 0x1bc   : > { %v7308_v8 = vpop.f32.mrf.mxu0 }
 0x1bd   : > { %7652 = vst [vmem:[#allocation45_spill] sm:$0xff] %v7308_v8  ;;  %v7310_v1 = vpop.f32.mrf.mxu1 }
 0x1be   : > { %7653 = vst [vmem:[#allocation46_spill] sm:$0xff] %v7310_v1  ;;  %v7313_v46 = vpop.f32.mrf.mxu0 }
 0x1bf   : > { %v7315_v31 = vpop.f32.mrf.mxu1 }
 0x1c0   : > { %v7319_v17 = vpop.f32.mrf.mxu0 }
 0x1c1   : > { %7654 = vst [vmem:[#allocation47_spill] sm:$0xff] %v7319_v17  ;;  %v5651_v4 = vpop.f32.mrf.mxu1 }
 0x1c2   : > { %v3706_v8 = vadd.f32 %v5651_v4, %v3252_v20  ;;  %v7324_v1 = vpop.f32.mrf.mxu0 }
 0x1c3   : > { %v3514_v41 = vpop.f32.mrf.mxu1 }
 0x1c4   : > { %v3705_v51 = vadd.f32 %v3514_v41, %v3251_v32  ;;  %v5701_v9 = vpop.f32.mrf.mxu0 }
 0x1c5   : > { %v5654_v40 = vpop.f32.mrf.mxu1  ;;  %v4160_v17 = vadd.f32 %v5701_v9, %v3706_v8 }
 0x1c6   : > { %v3708_v2 = vadd.f32 %v5654_v40, %v3254_v56  ;;  %v3968_v20 = vpop.f32.mrf.mxu0 }
 0x1c7   : > { %v3524_v4 = vpop.f32.mrf.mxu1  ;;  %4192 = vst [vmem:[%s6011_s8 + $0x8] sm:$0xff] %v4160_v17  ;;  %v4159_v26 = vadd.f32 %v3968_v20, %v3705_v51  ;;  %v4297_v8 = vmul.f32 %v4160_v17, %v4160_v17 }
 0x1c8   : > { %v3707_v13 = vadd.f32 %v3524_v4, %v3253_v50  ;;  %v5704_v6 = vpop.f32.mrf.mxu0 }
 0x1c9   : > { %v5657_v32 = vpop.f32.mrf.mxu1  ;;  %4191 = vst [vmem:[%s6011_s8] sm:$0xff] %v4159_v26  ;;  %v4256_v41 = vadd.f32 %v4160_v17, %v4159_v26  ;;  %v4296_v37 = vmul.f32 %v4159_v26, %v4159_v26  ;;  %v4162_v21 = vadd.f32 %v5704_v6, %v3708_v2  ;;  %v3258_v17 = vadd.f32 %v7219_v30, %v2803_v53 }
 0x1ca   : > { %v3710_v56 = vadd.f32 %v5657_v32, %v3256_v28  ;;  %v3978_v51 = vpop.f32.mrf.mxu0  ;;  %v2807_v28 = vadd.f32 %v7229_v43, %v7133_v35 }
 0x1cb   : > { %v3534_v34 = vpop.f32.mrf.mxu1  ;;  %v4328_v47 = vadd.f32 %v4297_v8, %v4296_v37  ;;  %4194 = vst [vmem:[%s6011_s8 + $0x18] sm:$0xff] %v4162_v21  ;;  %v4161_v12 = vadd.f32 %v3978_v51, %v3707_v13  ;;  %v4299_v26 = vmul.f32 %v4162_v21, %v4162_v21  ;;  %v3260_v13 = vadd.f32 %v7227_v48, %v2805_v15 }
 0x1cc   : > { %v3709_v9 = vadd.f32 %v3534_v34, %v3255_v24  ;;  %v5707_v40 = vpop.f32.mrf.mxu0  ;;  %v2806_v37 = vadd.f32 %v7233_v57, %v7136_v23  ;;  %v2809_v34 = vadd.f32 %v7237_v36, %v7139_v49 }
 0x1cd   : > { %v5660_v50 = vpop.f32.mrf.mxu1  ;;  %4193 = vst [vmem:[%s6011_s8 + $0x10] sm:$0xff] %v4161_v12  ;;  %v4257_v2 = vadd.f32 %v4256_v41, %v4161_v12  ;;  %v4298_v59 = vmul.f32 %v4161_v12, %v4161_v12  ;;  %v4164_v18 = vadd.f32 %v5707_v40, %v3710_v56  ;;  %v2808_v40 = vadd.f32 %v7241_v29, %v7142_v10 }
 0x1ce   : > { %v3712_v20 = vadd.f32 %v5660_v50, %v3258_v17  ;;  %v3988_v4 = vpop.f32.mrf.mxu0  ;;  %v3261_v50 = vadd.f32 %v7239_v11, %v2806_v37 }
 0x1cf   : > { %v3544_v33 = vpop.f32.mrf.mxu1  ;;  %v4329_v55 = vadd.f32 %v4328_v47, %v4298_v59  ;;  %4196 = vst [vmem:[%s6011_s8 + $0x28] sm:$0xff] %v4164_v18  ;;  %v4163_v30 = vadd.f32 %v3988_v4, %v3709_v9  ;;  %v4258_v53 = vadd.f32 %v4257_v2, %v4162_v21  ;;  %v3259_v21 = vadd.f32 %v7231_v14, %v2804_v27 }
 0x1d0   : > { %v3711_v6 = vadd.f32 %v3544_v33, %v3257_v22  ;;  %v5710_v32 = vpop.f32.mrf.mxu0  ;;  %v4301_v35 = vmul.f32 %v4164_v18, %v4164_v18  ;;  %v3262_v47 = vadd.f32 %v7235_v7, %v2807_v28  ;;  %v2811_v22 = vadd.f32 %v7245_v62, %v7145_v60 }
 0x1d1   : > { %v5663_v8 = vpop.f32.mrf.mxu1  ;;  %4195 = vst [vmem:[%s6011_s8 + $0x20] sm:$0xff] %v4163_v30  ;;  %v4259_v61 = vadd.f32 %v4258_v53, %v4163_v30  ;;  %v4300_v63 = vmul.f32 %v4163_v30, %v4163_v30  ;;  %v4330_v39 = vadd.f32 %v4329_v55, %v4299_v26  ;;  %v4166_v41 = vadd.f32 %v5710_v32, %v3712_v20 }
 0x1d2   : > { %v3714_v58 = vadd.f32 %v5663_v8, %v3260_v13  ;;  %v3998_v24 = vpop.f32.mrf.mxu0  ;;  %v3264_v20 = vadd.f32 %v7243_v54, %v2809_v34  ;;  %v2810_v30 = vadd.f32 %v7249_v42, %v7148_v25  ;;  %v3263_v53 = vadd.f32 %v7247_v45, %v2808_v40  ;;  %v7656_v34 = vld [vmem:[#allocation22_spill] sm:$0xff]  ;;  %v7659_v40 = vld [vmem:[#allocation24_spill] sm:$0xff] }
 0x1d3   : > { %v3554_v43 = vpop.f32.mrf.mxu1  ;;  %v4331_v48 = vadd.f32 %v4330_v39, %v4300_v63  ;;  %4198 = vst [vmem:[%s6011_s8 + $0x38] sm:$0xff] %v4166_v41  ;;  %v4165_v56 = vadd.f32 %v3998_v24, %v3711_v6  ;;  %v4260_v51 = vadd.f32 %v4259_v61, %v4164_v18  ;;  %v4303_v49 = vmul.f32 %v4166_v41, %v4166_v41 }
 0x1d4   : > { %v3713_v12 = vadd.f32 %v3554_v43, %v3259_v21  ;;  %v5713_v15 = vpop.f32.mrf.mxu0  ;;  %v2813_v8 = vadd.f32 %v7253_v3, %v7151_v16  ;;  %v3266_v61 = vadd.f32 %v7251_v52, %v2811_v22  ;;  %v2812_v21 = vadd.f32 %v7257_v0, %v7154_v44  ;;  %v7661_v22 = vld [vmem:[#allocation27_spill] sm:$0xff] }
 0x1d5   : > { %v5666_v17 = vpop.f32.mrf.mxu1  ;;  %4197 = vst [vmem:[%s6011_s8 + $0x30] sm:$0xff] %v4165_v56  ;;  %v4261_v23 = vadd.f32 %v4260_v51, %v4165_v56  ;;  %v4302_v14 = vmul.f32 %v4165_v56, %v4165_v56  ;;  %v4332_v57 = vadd.f32 %v4331_v48, %v4301_v35  ;;  %v4168_v9 = vadd.f32 %v5713_v15, %v3714_v58  ;;  %v7655_v56 = vld [vmem:[#allocation23_spill] sm:$0xff] }
 0x1d6   : > { %v3716_v2 = vadd.f32 %v5666_v17, %v3262_v47  ;;  %v4008_v59 = vpop.f32.mrf.mxu0  ;;  %v3265_v58 = vadd.f32 %v7255_v5, %v2810_v30  ;;  %v2815_v51 = vadd.f32 %v7655_v56, %v7157_v19  ;;  %v3268_v47 = vadd.f32 %v7656_v34, %v2813_v8  ;;  %v7670_v56 = vld [vmem:[#allocation33_spill] sm:$0xff]  ;;  %v7671_v34 = vld [vmem:[#allocation32_spill] sm:$0xff] }
 0x1d7   : > { %v3564_v36 = vpop.f32.mrf.mxu1  ;;  %v4333_v7 = vadd.f32 %v4332_v57, %v4302_v14  ;;  %4200 = vst [vmem:[%s6011_s8 + $0x48] sm:$0xff] %v4168_v9  ;;  %v4167_v18 = vadd.f32 %v4008_v59, %v3713_v12  ;;  %v4262_v27 = vadd.f32 %v4261_v23, %v4166_v41  ;;  %v4305_v60 = vmul.f32 %v4168_v9, %v4168_v9  ;;  %v7657_v14 = vld [vmem:[#allocation9_spill] sm:$0xff] }
 0x1d8   : > { %v3715_v4 = vadd.f32 %v3564_v36, %v3261_v50  ;;  %v5716_v26 = vpop.f32.mrf.mxu0  ;;  %v7658_v57 = vld [vmem:[#allocation25_spill] sm:$0xff]  ;;  %v3267_v50 = vadd.f32 %v7659_v40, %v2812_v21  ;;  %v7674_v40 = vld [vmem:[#allocation34_spill] sm:$0xff] }
 0x1d9   : > { %v5669_v33 = vpop.f32.mrf.mxu1  ;;  %4199 = vst [vmem:[%s6011_s8 + $0x40] sm:$0xff] %v4167_v18  ;;  %v4263_v10 = vadd.f32 %v4262_v27, %v4167_v18  ;;  %v4304_v11 = vmul.f32 %v4167_v18, %v4167_v18  ;;  %v4334_v29 = vadd.f32 %v4333_v7, %v4303_v49  ;;  %v4170_v55 = vadd.f32 %v5716_v26, %v3716_v2  ;;  %v7660_v27 = vld [vmem:[#allocation10_spill] sm:$0xff] }
 0x1da   : > { %v3718_v28 = vadd.f32 %v5669_v33, %v3264_v20  ;;  %v4018_v13 = vpop.f32.mrf.mxu0  ;;  %v2817_v20 = vadd.f32 %v7661_v22, %v7660_v27  ;;  %v7675_v27 = vld [vmem:[#allocation15_spill] sm:$0xff]  ;;  %v7676_v22 = vld [vmem:[#allocation37_spill] sm:$0xff] }
 0x1db   : > { %v3574_v62 = vpop.f32.mrf.mxu1  ;;  %v4335_v54 = vadd.f32 %v4334_v29, %v4304_v11  ;;  %4202 = vst [vmem:[%s6011_s8 + $0x58] sm:$0xff] %v4170_v55  ;;  %v4169_v6 = vadd.f32 %v4018_v13, %v3715_v4  ;;  %v4264_v32 = vadd.f32 %v4263_v10, %v4168_v9  ;;  %v4307_v16 = vmul.f32 %v4170_v55, %v4170_v55  ;;  %v7662_v4 = vld [vmem:[#allocation26_spill] sm:$0xff]  ;;  %v7664_v13 = vld [vmem:[#allocation29_spill] sm:$0xff] }
 0x1dc   : > { %v3717_v63 = vadd.f32 %v3574_v62, %v3263_v53  ;;  %v5719_v39 = vpop.f32.mrf.mxu0  ;;  %v2814_v9 = vadd.f32 %v7658_v57, %v7657_v14  ;;  %v3270_v26 = vadd.f32 %v7662_v4, %v2815_v51  ;;  %v7665_v62 = vld [vmem:[#allocation28_spill] sm:$0xff]  ;;  %v7672_v14 = vld [vmem:[#allocation14_spill] sm:$0xff]  ;;  %v7673_v57 = vld [vmem:[#allocation35_spill] sm:$0xff] }
 0x1dd   : > { %v5672_v41 = vpop.f32.mrf.mxu1  ;;  %4201 = vst [vmem:[%s6011_s8 + $0x50] sm:$0xff] %v4169_v6  ;;  %v4265_v25 = vadd.f32 %v4264_v32, %v4169_v6  ;;  %v4306_v45 = vmul.f32 %v4169_v6, %v4169_v6  ;;  %v4336_v42 = vadd.f32 %v4335_v54, %v4305_v60  ;;  %v4172_v37 = vadd.f32 %v5719_v39, %v3718_v28  ;;  %v7663_v28 = vld [vmem:[#allocation11_spill] sm:$0xff]  ;;  %v7677_v4 = vld [vmem:[#allocation36_spill] sm:$0xff] }
 0x1de   : > { %v3720_v24 = vadd.f32 %v5672_v41, %v3266_v61  ;;  %v4028_v35 = vpop.f32.mrf.mxu0  ;;  %v2816_v60 = vadd.f32 %v7664_v13, %v7663_v28  ;;  %v3269_v54 = vadd.f32 %v7665_v62, %v2814_v9  ;;  %v2821_v9 = vadd.f32 %v7673_v57, %v7672_v14  ;;  %v7678_v28 = vld [vmem:[#allocation16_spill] sm:$0xff]  ;;  %v7679_v13 = vld [vmem:[#allocation39_spill] sm:$0xff]  ;;  %v7680_v62 = vld [vmem:[#allocation38_spill] sm:$0xff] }
 0x1df   : > { %v3584_v3 = vpop.f32.mrf.mxu1  ;;  %v4337_v52 = vadd.f32 %v4336_v42, %v4306_v45  ;;  %4204 = vst [vmem:[%s6011_s8 + $0x68] sm:$0xff] %v4172_v37  ;;  %v4171_v43 = vadd.f32 %v4028_v35, %v3717_v63  ;;  %v4266_v48 = vadd.f32 %v4265_v25, %v4170_v55  ;;  %v4309_v19 = vmul.f32 %v4172_v37, %v4172_v37  ;;  %v7666_v25 = vld [vmem:[#allocation12_spill] sm:$0xff]  ;;  %v7667_v45 = vld [vmem:[#allocation31_spill] sm:$0xff] }
 0x1e0   : > { %v3719_v12 = vadd.f32 %v3584_v3, %v3265_v58  ;;  %v5722_v15 = vpop.f32.mrf.mxu0  ;;  %v2819_v42 = vadd.f32 %v7667_v45, %v7666_v25  ;;  %v7681_v25 = vld [vmem:[#allocation17_spill] sm:$0xff]  ;;  %v7687_v14 = vld [vmem:[#allocation19_spill] sm:$0xff] }
 0x1e1   : > { %v5675_v17 = vpop.f32.mrf.mxu1  ;;  %4203 = vst [vmem:[%s6011_s8 + $0x60] sm:$0xff] %v4171_v43  ;;  %v4267_v44 = vadd.f32 %v4266_v48, %v4171_v43  ;;  %v4308_v0 = vmul.f32 %v4171_v43, %v4171_v43  ;;  %v4338_v5 = vadd.f32 %v4337_v52, %v4307_v16  ;;  %v4174_v23 = vadd.f32 %v5722_v15, %v3720_v24  ;;  %v7669_v48 = vld [vmem:[#allocation13_spill] sm:$0xff] }
 0x1e2   : > { %v3722_v2 = vadd.f32 %v5675_v17, %v3268_v47  ;;  %v4038_v59 = vpop.f32.mrf.mxu0  ;;  %v2818_v51 = vadd.f32 %v7670_v56, %v7669_v48  ;;  %v3271_v47 = vadd.f32 %v7671_v34, %v2816_v60  ;;  %v2823_v60 = vadd.f32 %v7679_v13, %v7678_v28  ;;  %v7682_v45 = vld [vmem:[#allocation41_spill] sm:$0xff]  ;;  %v7684_v48 = vld [vmem:[#allocation18_spill] sm:$0xff]  ;;  %v7685_v56 = vld [vmem:[#allocation43_spill] sm:$0xff] }
 0x1e3   : > { %v3594_v49 = vpop.f32.mrf.mxu1  ;;  %v4339_v36 = vadd.f32 %v4338_v5, %v4308_v0  ;;  %4206 = vst [vmem:[%s6011_s8 + $0x78] sm:$0xff] %v4174_v23  ;;  %v4173_v7 = vadd.f32 %v4038_v59, %v3719_v12  ;;  %v4268_v18 = vadd.f32 %v4267_v44, %v4172_v37  ;;  %v4311_v8 = vmul.f32 %v4174_v23, %v4174_v23  ;;  %v7668_v37 = vld [vmem:[#allocation30_spill] sm:$0xff] }
 0x1e4   : > { %v3721_v33 = vadd.f32 %v3594_v49, %v3267_v50  ;;  %v5725_v10 = vpop.f32.mrf.mxu0  ;;  %v3272_v21 = vadd.f32 %v7668_v37, %v2817_v20  ;;  %v3274_v50 = vadd.f32 %v7674_v40, %v2819_v42  ;;  %v2820_v20 = vadd.f32 %v7676_v22, %v7675_v27  ;;  %v7683_v37 = vld [vmem:[#allocation40_spill] sm:$0xff]  ;;  %v7686_v34 = vld [vmem:[#allocation42_spill] sm:$0xff] }
 0x1e5   : > { %v5678_v11 = vpop.f32.mrf.mxu1  ;;  %4205 = vst [vmem:[%s6011_s8 + $0x70] sm:$0xff] %v4173_v7  ;;  %v4269_v29 = vadd.f32 %v4268_v18, %v4173_v7  ;;  %v4310_v55 = vmul.f32 %v4173_v7, %v4173_v7  ;;  %v4340_v30 = vadd.f32 %v4339_v36, %v4309_v19  ;;  %v4176_v53 = vadd.f32 %v5725_v10, %v3722_v2  ;;  %v7690_v27 = vld [vmem:[#allocation46_spill] sm:$0xff] }
 0x1e6   : > { %v3724_v6 = vadd.f32 %v5678_v11, %v3270_v26  ;;  %v4048_v32 = vpop.f32.mrf.mxu0  ;;  %v3273_v26 = vadd.f32 %v7677_v4, %v2818_v51  ;;  %v2822_v42 = vadd.f32 %v7682_v45, %v7681_v25  ;;  %v2825_v51 = vadd.f32 %v7685_v56, %v7684_v48 }
 0x1e7   : > { %v3604_v61 = vpop.f32.mrf.mxu1  ;;  %v4341_v63 = vadd.f32 %v4340_v30, %v4310_v55  ;;  %4208 = vst [vmem:[%s6011_s8 + $0x88] sm:$0xff] %v4176_v53  ;;  %v4175_v39 = vadd.f32 %v4048_v32, %v3721_v33  ;;  %v4270_v41 = vadd.f32 %v4269_v29, %v4174_v23  ;;  %v4313_v17 = vmul.f32 %v4176_v53, %v4176_v53 }
 0x1e8   : > { %v3723_v58 = vadd.f32 %v3604_v61, %v3269_v54  ;;  %v5728_v24 = vpop.f32.mrf.mxu0  ;;  %v3276_v54 = vadd.f32 %v7680_v62, %v2821_v9  ;;  %v2824_v57 = vadd.f32 %v7305_v38, %v7687_v14  ;;  %v7688_v9 = vld [vmem:[#allocation44_spill] sm:$0xff] }
 0x1e9   : > { %v5681_v35 = vpop.f32.mrf.mxu1  ;;  %4207 = vst [vmem:[%s6011_s8 + $0x80] sm:$0xff] %v4175_v39  ;;  %v4271_v16 = vadd.f32 %v4270_v41, %v4175_v39  ;;  %v4312_v3 = vmul.f32 %v4175_v39, %v4175_v39  ;;  %v4342_v52 = vadd.f32 %v4341_v63, %v4311_v8  ;;  %v4178_v43 = vadd.f32 %v5728_v24, %v3724_v6 }
 0x1ea   : > { %v3726_v12 = vadd.f32 %v5681_v35, %v3272_v21  ;;  %v4058_v15 = vpop.f32.mrf.mxu0  ;;  %v3275_v21 = vadd.f32 %v7683_v37, %v2820_v20  ;;  %v3277_v40 = vadd.f32 %v7688_v9, %v2822_v42  ;;  %v7691_v20 = vld [vmem:[#allocation45_spill] sm:$0xff]  ;;  %v3279_v28 = vadd.f32 %v7313_v46, %v2824_v57 }
 0x1eb   : > { %v3614_v44 = vpop.f32.mrf.mxu1  ;;  %v4343_v0 = vadd.f32 %v4342_v52, %v4312_v3  ;;  %4210 = vst [vmem:[%s6011_s8 + $0x98] sm:$0xff] %v4178_v43  ;;  %v4177_v5 = vadd.f32 %v4058_v15, %v3723_v58  ;;  %v4272_v23 = vadd.f32 %v4271_v16, %v4176_v53  ;;  %v4315_v30 = vmul.f32 %v4178_v43, %v4178_v43 }
 0x1ec   : > { %v3725_v2 = vadd.f32 %v3614_v44, %v3271_v47  ;;  %v5731_v59 = vpop.f32.mrf.mxu0  ;;  %v3278_v47 = vadd.f32 %v7686_v34, %v2823_v60  ;;  %v3280_v4 = vadd.f32 %v7691_v20, %v2825_v51 }
 0x1ed   : > { %v5684_v19 = vpop.f32.mrf.mxu1  ;;  %4209 = vst [vmem:[%s6011_s8 + $0x90] sm:$0xff] %v4177_v5  ;;  %v4314_v49 = vmul.f32 %v4177_v5, %v4177_v5  ;;  %v4180_v36 = vadd.f32 %v5731_v59, %v3726_v12  ;;  %v4273_v7 = vadd.f32 %v4272_v23, %v4177_v5  ;;  %v4344_v18 = vadd.f32 %v4343_v0, %v4313_v17 }
 0x1ee   : > { %v3728_v33 = vadd.f32 %v5684_v19, %v3274_v50  ;;  %v4068_v10 = vpop.f32.mrf.mxu0 }
 0x1ef   : > { %v3624_v11 = vpop.f32.mrf.mxu1  ;;  %4212 = vst [vmem:[%s6011_s8 + $0xa8] sm:$0xff] %v4180_v36  ;;  %v4179_v29 = vadd.f32 %v4068_v10, %v3725_v2  ;;  %v4274_v55 = vadd.f32 %v4273_v7, %v4178_v43  ;;  %v4345_v53 = vadd.f32 %v4344_v18, %v4314_v49  ;;  %v4317_v52 = vmul.f32 %v4180_v36, %v4180_v36  ;;  %v7689_v18 = vld [vmem:[#allocation20_spill] sm:$0xff] }
 0x1f0   : > { %v3727_v6 = vadd.f32 %v3624_v11, %v3273_v26  ;;  %v5734_v32 = vpop.f32.mrf.mxu0  ;;  %v2827_v22 = vadd.f32 %v7690_v27, %v7689_v18 }
 0x1f1   : > { %v5687_v8 = vpop.f32.mrf.mxu1  ;;  %4211 = vst [vmem:[%s6011_s8 + $0xa0] sm:$0xff] %v4179_v29  ;;  %v4182_v61 = vadd.f32 %v5734_v32, %v3728_v33  ;;  %v4275_v63 = vadd.f32 %v4274_v55, %v4179_v29  ;;  %v4316_v39 = vmul.f32 %v4179_v29, %v4179_v29  ;;  %v4346_v41 = vadd.f32 %v4345_v53, %v4315_v30  ;;  %v7692_v30 = vld [vmem:[#allocation21_spill] sm:$0xff] }
 0x1f2   : > { %v3730_v58 = vadd.f32 %v5687_v8, %v3276_v54  ;;  %v4078_v24 = vpop.f32.mrf.mxu0  ;;  %v2826_v53 = vadd.f32 %v7315_v31, %v7692_v30 }
 0x1f3   : > { %v3634_v35 = vpop.f32.mrf.mxu1  ;;  %4214 = vst [vmem:[%s6011_s8 + $0xb8] sm:$0xff] %v4182_v61  ;;  %v4181_v16 = vadd.f32 %v4078_v24, %v3727_v6  ;;  %v4276_v3 = vadd.f32 %v4275_v63, %v4180_v36  ;;  %v4347_v43 = vadd.f32 %v4346_v41, %v4316_v39  ;;  %v4319_v36 = vmul.f32 %v4182_v61, %v4182_v61 }
 0x1f4   : > { %v3729_v12 = vadd.f32 %v3634_v35, %v3275_v21  ;;  %v5737_v15 = vpop.f32.mrf.mxu0  ;;  %v3281_v37 = vadd.f32 %v7324_v1, %v2826_v53 }
 0x1f5   : > { %v5690_v17 = vpop.f32.mrf.mxu1  ;;  %4213 = vst [vmem:[%s6011_s8 + $0xb0] sm:$0xff] %v4181_v16  ;;  %v4184_v44 = vadd.f32 %v5737_v15, %v3730_v58  ;;  %v4277_v0 = vadd.f32 %v4276_v3, %v4181_v16  ;;  %v4318_v5 = vmul.f32 %v4181_v16, %v4181_v16  ;;  %v4348_v23 = vadd.f32 %v4347_v43, %v4317_v52 }
 0x1f6   : > { %v3732_v50 = vadd.f32 %v5690_v17, %v3278_v47  ;;  %v4088_v2 = vpop.f32.mrf.mxu0 }
 0x1f7   : > { %v3644_v59 = vpop.f32.mrf.mxu1  ;;  %4216 = vst [vmem:[%s6011_s8 + $0xc8] sm:$0xff] %v4184_v44  ;;  %v4183_v19 = vadd.f32 %v4088_v2, %v3729_v12  ;;  %v4278_v49 = vadd.f32 %v4277_v0, %v4182_v61  ;;  %v4349_v7 = vadd.f32 %v4348_v23, %v4318_v5  ;;  %v4321_v32 = vmul.f32 %v4184_v44, %v4184_v44  ;;  %v7693_v61 = vld [vmem:[#allocation47_spill] sm:$0xff] }
 0x1f8   : > { %v3731_v26 = vadd.f32 %v3644_v59, %v3277_v40  ;;  %v5740_v33 = vpop.f32.mrf.mxu0  ;;  %v3282_v63 = vadd.f32 %v7693_v61, %v2827_v22 }
 0x1f9   : > { %v5693_v10 = vpop.f32.mrf.mxu1  ;;  %4215 = vst [vmem:[%s6011_s8 + $0xc0] sm:$0xff] %v4183_v19  ;;  %v4186_v38 = vadd.f32 %v5740_v33, %v3732_v50  ;;  %v4279_v11 = vadd.f32 %v4278_v49, %v4183_v19  ;;  %v4320_v29 = vmul.f32 %v4183_v19, %v4183_v19  ;;  %v4350_v55 = vadd.f32 %v4349_v7, %v4319_v36 }
 0x1fa   : > { %v3734_v13 = vadd.f32 %v5693_v10, %v3280_v4  ;;  %v4098_v60 = vpop.f32.mrf.mxu0 }
 0x1fb   : > { %v3654_v62 = vpop.f32.mrf.mxu1  ;;  %4218 = vst [vmem:[%s6011_s8 + $0xd8] sm:$0xff] %v4186_v38  ;;  %v4185_v54 = vadd.f32 %v4098_v60, %v3731_v26  ;;  %v4280_v6 = vadd.f32 %v4279_v11, %v4184_v44  ;;  %v4351_v8 = vadd.f32 %v4350_v55, %v4320_v29  ;;  %v4323_v3 = vmul.f32 %v4186_v38, %v4186_v38 }
 0x1fc   : > { %v3733_v39 = vadd.f32 %v3654_v62, %v3279_v28  ;;  %v5743_v41 = vpop.f32.mrf.mxu0 }
 0x1fd   : > { %v5696_v25 = vpop.f32.mrf.mxu1  ;;  %4217 = vst [vmem:[%s6011_s8 + $0xd0] sm:$0xff] %v4185_v54  ;;  %v4188_v31 = vadd.f32 %v5743_v41, %v3734_v13  ;;  %v4281_v45 = vadd.f32 %v4280_v6, %v4185_v54  ;;  %v4322_v46 = vmul.f32 %v4185_v54, %v4185_v54  ;;  %v4352_v42 = vadd.f32 %v4351_v8, %v4321_v32 }
 0x1fe   : > { %v3736_v21 = vadd.f32 %v5696_v25, %v3282_v63  ;;  %v4108_v58 = vpop.f32.mrf.mxu0 }
 0x1ff   : > { %v3664_v24 = vpop.f32.mrf.mxu1  ;;  %4220 = vst [vmem:[%s6011_s8 + $0xe8] sm:$0xff] %v4188_v31  ;;  %v4187_v35 = vadd.f32 %v4108_v58, %v3733_v39  ;;  %v4282_v16 = vadd.f32 %v4281_v45, %v4186_v38  ;;  %v4353_v52 = vadd.f32 %v4352_v42, %v4322_v46  ;;  %v4325_v17 = vmul.f32 %v4188_v31, %v4188_v31 }
 0x200   : > { %v3735_v43 = vadd.f32 %v3664_v24, %v3281_v37  ;;  %v5746_v48 = vpop.f32.mrf.mxu0 }
 0x201   : > { %4219 = vst [vmem:[%s6011_s8 + $0xe0] sm:$0xff] %v4187_v35  ;;  %v4190_v56 = vadd.f32 %v5746_v48, %v3736_v21  ;;  %v4283_v51 = vadd.f32 %v4282_v16, %v4187_v35  ;;  %v4324_v34 = vmul.f32 %v4187_v35, %v4187_v35  ;;  %v4354_v1 = vadd.f32 %v4353_v52, %v4323_v3 }
 0x202   : > { %v4118_v47 = vpop.f32.mrf.mxu0 }
 0x203   : > { %4222 = vst [vmem:[%s6011_s8 + $0xf8] sm:$0xff] %v4190_v56  ;;  %v4189_v12 = vadd.f32 %v4118_v47, %v3735_v43  ;;  %v4284_v15 = vadd.f32 %v4283_v51, %v4188_v31  ;;  %v4355_v44 = vadd.f32 %v4354_v1, %v4324_v34 }
 0x205   : > { %4221 = vst [vmem:[%s6011_s8 + $0xf0] sm:$0xff] %v4189_v12  ;;  %v4285_v0 = vadd.f32 %v4284_v15, %v4189_v12  ;;  %v4326_v5 = vmul.f32 %v4189_v12, %v4189_v12  ;;  %v4356_v23 = vadd.f32 %v4355_v44, %v4325_v17 }
 0x206   : > { %5819 = shalt.err (!%p5816_p7)
}
 0x207   : > { %s5820_s27 = scalar_lea.hbm %s7447_s22, 4096  ;;  %s5824_s9 = scalar_lea.hbm %s7515_s2, 8192 }
 0x208   : > { %p5821_p8 = scmp.ne.s32.totalorder %s7447_s22, %s5820_s27  ;;  %p5825_p11 = scmp.lt.s32.totalorder %s7447_s22, %s7515_s2 }
 0x209   : > { %p5826_p12 = scmp.lt.s32.totalorder %s5824_s9, %s5820_s27 }
 0x20a   : > { %p5822_p9 = pnand %p5821_p8, %p5991_p5 }
 0x20b   : > { %p5827_p13 = por %p5826_p12, %p5825_p11 }
 0x20c   : > { %p5823_p10 = pneg %p5822_p9 }
 0x20e   : > { %p5828_p0 = pnand %p5827_p13, %p5823_p10 }
 0x210   : > { %5831 = shalt.err (!%p5828_p0)
}
 0x211   : > { %s5922_s12 = smov 128   ;;  %s5923_s7 = smov 8   ;;  %v4286_v14 = vadd.f32 %v4285_v0, %v4190_v56  ;;  %v4327_v57 = vmul.f32 %v4190_v56, %v4190_v56  ;;  %v4357_v9 = vadd.f32 %v4356_v23, %v4326_v5  ;;  %v4255_v22 = vld [vmem:[#allocation4] sm:$0x1]  ;;  %v4295_v26 = vld [vmem:[#allocation6] sm:$0x1] }
 0x212   : > { %5750 = dma.vmem_to_hbm [thread:$0]  (%p5991_p5), %s7449_s13, 4096, %s7447_s22, %s7455_s23, %s5922_s12, %s5922_s12, %s5923_s7  }
 0x213   : > { %v4287_v40 = vrot.slane %v4286_v14, 4  ;;  %v4358_v50 = vadd.f32 %v4357_v9, %v4327_v57  ;;  %s5924_s14 = smov [#allocation4]   ;;  %s5925_s25 = smov [#allocation6]  }
 0x214   : > { %s4395_s20 = sshll.u32 %s5924_s14, 4  ;;  %s4406_s13 = sshll.u32 %s5925_s25, 4  ;;  %s4396_s20 = int_to_ptr.vmem [resolvable:$true] %s4395_s20  ;;  %s4407_s13 = int_to_ptr.vmem [resolvable:$true] %s4406_s13 }
 0x215   : > { %v4288_v2 = vadd.f32 %v4287_v40, %v4286_v14  ;;  %v4359_v59 = vrot.slane %v4358_v50, 4  ;;  %s5832_s22 = scalar_lea.vmem %s4396_s20, 16  ;;  %s5838_s23 = scalar_lea.vmem %s4396_s20, 32 }
 0x216   : > { %p5833_p5 = scmp.ne.s32.totalorder %s4396_s20, %s5832_s22  ;;  %p5839_p4 = scmp.lt.s32.totalorder %s4396_s20, %s4396_s20 }
 0x217   : > { %v4289_v19 = vrot.slane %v4288_v2, 2  ;;  %v4360_v49 = vadd.f32 %v4359_v59, %v4358_v50  ;;  %p5840_p7 = scmp.lt.s32.totalorder %s5838_s23, %s5832_s22 }
 0x218   : > { %p5834_p1 = pnand %p5833_p5, %p84_p2 }
 0x219   : > { %v4290_v36 = vadd.f32 %v4289_v19, %v4288_v2  ;;  %v4361_v7 = vrot.slane %v4360_v49, 2  ;;  %p5841_p8 = por %p5840_p7, %p5839_p4 }
 0x21a   : > { %p5835_p3 = pneg %p5834_p1 }
 0x21b   : > { %v4291_v18 = vrot.slane %v4290_v36, 1  ;;  %v4362_v27 = vadd.f32 %v4361_v7, %v4360_v49 }
 0x21c   : > { %p5842_p9 = pnand %p5841_p8, %p5835_p3 }
 0x21d   : > { %v4292_v20 = vadd.f32 %v4291_v18, %v4290_v36  ;;  %v4363_v4 = vrot.slane %v4362_v27, 1 }
 0x21f   : > { %v4293_v33 = vadd.f32 %v4292_v20, %v4255_v22  ;;  %v4364_v10 = vadd.f32 %v4363_v4, %v4362_v27 }
 0x221   : > { %4294 = vst [vmem:[#allocation4] sm:$0x1] %v4293_v33  ;;  %v4365_v38 = vadd.f32 %v4364_v10, %v4295_v26 }
 0x222   : > { %5845 = shalt.err (!%p5842_p9)
}
 0x223   : > { %5752 = dma.vmem_to_hbm [thread:$0]  (%p84_p2), %s4396_s20, 16, %s7516_s3, [#allocation5]   ;;  %4366 = vst [vmem:[#allocation6] sm:$0x1] %v4365_v38 }
 0x224   : > { %s5856_s30 = scalar_lea.vmem %s4407_s13, 16  ;;  %s5862_s5 = scalar_lea.vmem %s4407_s13, 32 }
 0x225   : > { %p5857_p10 = scmp.ne.s32.totalorder %s4407_s13, %s5856_s30  ;;  %p5863_p13 = scmp.lt.s32.totalorder %s4407_s13, %s4407_s13 }
 0x226   : > { %p5864_p0 = scmp.lt.s32.totalorder %s5862_s5, %s5856_s30 }
 0x227   : > { %p5858_p11 = pnand %p5857_p10, %p84_p2 }
 0x228   : > { %p5865_p5 = por %p5864_p0, %p5863_p13 }
 0x229   : > { %p5859_p12 = pneg %p5858_p11 }
 0x22b   : > { %p5866_p1 = pnand %p5865_p5, %p5859_p12 }
 0x22d   : > { %5869 = shalt.err (!%p5866_p1)
}
 0x22e   : > { %5754 = dma.vmem_to_hbm [thread:$0]  (%p84_p2), %s4407_s13, 16, %s7517_s4, [#allocation5]  }
 0x22f   : > { %5897 = dma.done.wait (%p84_p2), [#allocation5], 32  }
 0x230   : > { %5899 = vsyncadd (%p84_p2), [#allocation5], 4294967264 }
 0x231 PF: > { %p5768_p3 = scmp.ge.s32.totalorder %s5918_s18, 2  ;;  %s4426_s6 = sand.u32 1, %s5906_s15  }
 0x232   : > { %s4427_s9 = scalar_lea.sflag [#allocation3], %s4426_s6 }
 0x233   : > { %p5761_p4 = pnand %p5768_p3, %p5995_p6 }
 0x235   : > { %p5762_p7 = pneg %p5761_p4 }
 0x237   : > { %5901 = dma.done.wait (%p5762_p7), %s4427_s9, 4096  }
 0x238   : > { %5903 = vsyncadd (%p5762_p7), %s4427_s9, 4294963200  ;;  %p16_p8 = scmp.ge.s32.totalorder %s5976_s21, 4   ;;  %s7694_s15 = smov %s5910_s16 }
 0x239   : > { %s7695_s16 = smov %s5914_s17  ;;  %s7696_s17 = smov %s5987_s24 }
 0x23a   : > { %s7697_s18 = smov %s5976_s21  ;;  %18 = sbr.rel (!%p16_p8) target bundleno = 4 (0x4), region = 93 }
 0x23f   :  { %4432 = vsyncpa [#allocation3], 1 }
 0x240   :  { %4434 = vsyncpa [#allocation3 + $0x1], 1 }
 0x241   :  { %4435 = vsyncpa [#allocation5], 1 }

</bundles_post_ra>
